<compile_context>
chip_gen: v5e
topology: v5e:2x2
jax: 0.10.0
libtpu: 0.0.40
codegen_flags: <defaults>
</compile_context>

<pallas_src>
import math

import jax
import jax.numpy as jnp
from jax.experimental import pallas as pl
from jax.experimental.pallas import tpu as pltpu


def _round_up(x, m):
    return (x + m - 1) // m * m


def _device_kind():
    try:
        return jax.devices()[0].device_kind.lower()
    except Exception:
        return ""


_KIND = _device_kind()
# v5e has no bf16 VPU/EUP -> keep the transcendental path in f32 there.
_IS_V5E = ("v5e" in _KIND) or ("v5 lite" in _KIND) or ("v5litepod" in _KIND)
# Chips with 2 TensorCores behind one device (v7x / megacore v4, v5p): batch-split the decoder.
_MULTI_TC = any(t in _KIND for t in ("v7", "v5p", "v4"))


def _vmem_limit(need_bytes):
    """Generation-aware scoped-VMEM limit: most of physical VMEM, with headroom."""
    try:
        cap = int(pltpu.get_tpu_info().vmem_capacity_bytes)
    except Exception:
        cap = 64 << 20                       # conservative (v7x-sized) fallback
    hi = cap * 7 // 8                        # leave ~12.5% headroom below physical
    return int(min(max(need_bytes + (8 << 20), 32 << 20), hi))


# ----------------------------------------------------------------------------------
# Feature extraction: 3x3 / stride-2 / pad-1 conv (nc -> 512) + ReLU, 9 taps in-kernel.
# TODO(synk): ResNet_FeatureExtractor's definition is not included in the module source;
# it is substituted by a single conv+ReLU with the same output interface (b, 512, h', w').
# ----------------------------------------------------------------------------------
def conv3x3_s2_relu(x_nchw, weight, bias):
    """x_nchw: (B, Cin, H, W); weight: (Cout, Cin, 3, 3); bias: (Cout,).

    Returns (B, OH*OW, Cout) in bf16 — i.e. permute(0,2,3,1).view(b, h*w, c) of the conv.
    """
    B, Cin, H, W = x_nchw.shape
    Cout = weight.shape[0]
    OH = (H + 2 - 3) // 2 + 1
    OW = (W + 2 - 3) // 2 + 1
    M = OH * OW

    # Padded channels-last image, split into the 4 stride-2 row/col phases.  Total HBM
    # bytes written ~= 1x the padded input (vs. 2.25x patch matrix before), and each tap
    # becomes a *contiguous* window of one phase array -> no strided loads in the kernel.
    xp = jnp.pad(jnp.transpose(x_nchw, (0, 2, 3, 1)),
                 ((0, 0), (1, 1), (1, 1), (0, 0))).astype(jnp.bfloat16)
    phases = []
    for rp in range(2):
        for cp in range(2):
            phases.append(xp[:, rp::2, cp::2, :])          # (B, Hrp, Wcp, Cin)

    # Weight per tap: (Cout, Cin, 3, 3) -> (9, Cin, Cout), bf16 for the MXU; resident.
    w_taps = jnp.transpose(weight, (2, 3, 1, 0)).reshape(9, Cin, Cout).astype(jnp.bfloat16)
    b_row = bias.reshape(1, Cout).astype(jnp.float32)

    def kernel(p00_ref, p01_ref, p10_ref, p11_ref, w_ref, b_ref, o_ref):
        phase_refs = ((p00_ref, p01_ref), (p10_ref, p11_ref))
        acc = jnp.zeros((M, Cout), jnp.float32)
        for kh in range(3):
            for kw in range(3):
                img = phase_refs[kh % 2][kw % 2][0]         # (Hphase, Wphase, Cin)
                slab = img[kh // 2:kh // 2 + OH, kw // 2:kw // 2 + OW, :]
                a = slab.reshape(M, Cin)                    # (OH*OW, Cin)
                acc = acc + jnp.dot(a, w_ref[kh * 3 + kw],
                                    preferred_element_type=jnp.float32)
        out = jnp.maximum(acc + b_ref[...], 0.0)
        o_ref[0] = out.astype(o_ref.dtype)                  # bf16, 512-lane dense store

    in_specs = []
    for p in phases:
        hp, wp = int(p.shape[1]), int(p.shape[2])
        in_specs.append(pl.BlockSpec((1, hp, wp, Cin), lambda b: (b, 0, 0, 0)))
    in_specs += [
        pl.BlockSpec((9, Cin, Cout), lambda b: (0, 0, 0)),
        pl.BlockSpec((1, Cout), lambda b: (0, 0)),
    ]

    # rough VMEM footprint (lane/sublane padding of the tiny-Cin phase tiles included)
    phase_vmem = sum(2 * int(p.shape[1]) * _round_up(int(p.shape[2]), 8) * 128 * 2
                     for p in phases)
    need = (phase_vmem
            + 2 * M * Cout * 2                              # output block (bf16, dbl-buffered)
            + 9 * _round_up(Cin, 8) * Cout * 2              # resident weight
            + M * Cout * 4)                                  # f32 accumulator

    out = pl.pallas_call(
        kernel,
        out_shape=jax.ShapeDtypeStruct((B, M, Cout), jnp.bfloat16),
        grid=(B,),
        in_specs=in_specs,
        out_specs=pl.BlockSpec((1, M, Cout), lambda b: (b, 0, 0)),
        compiler_params=pltpu.CompilerParams(
            dimension_semantics=("parallel",),
            vmem_limit_bytes=_vmem_limit(need)),
    )(*phases, w_taps, b_row)

    return out                                               # (B, OH*OW, Cout) bf16


# ----------------------------------------------------------------------------------
# Attention decoder (AttentionCell + LSTMCell + generator), teacher-forcing path.
# The whole sequential decode loop runs inside one Pallas kernel; hidden/cell state
# lives in VMEM scratch across steps.
# ----------------------------------------------------------------------------------
def _make_decoder_kernel(attn_bf16):
    cdt = jnp.bfloat16 if attn_bf16 else jnp.float32

    def kernel(batch_H_ref, emb_ref,
               w_i2h_ref, w_h2h_ref, b_h2h_ref, w_score_ref,
               w_ih_ctx_ref, w_hh_ref, b_lstm_ref,
               w_gen_ref, b_gen_ref,
               probs_ref, h_ref, c_ref):
        bH = batch_H_ref[...]                                # (Bb, T, C) bf16
        Bb, T, C = bH.shape
        NH = w_h2h_ref.shape[0]
        num_steps = probs_ref.shape[0]

        # loop-invariant weight loads / broadcasts hoisted out of the decode loop
        w_h2h = w_h2h_ref[...]
        b_h2h = b_h2h_ref[...]
        w_score_bc = w_score_ref[...].astype(cdt)[None, :, :]       # (1, 1, NH)
        w_ih_ctx = w_ih_ctx_ref[...]
        w_hh = w_hh_ref[...]
        b_lstm = b_lstm_ref[...]
        w_gen = w_gen_ref[...]
        b_gen = b_gen_ref[...]

        # i2h projection of the visual features, computed once on the MXU
        proj = jnp.dot(bH.reshape(Bb * T, C), w_i2h_ref[...],
                       preferred_element_type=jnp.float32)
        proj = proj.reshape(Bb, T, NH).astype(cdt)

        h_ref[...] = jnp.zeros_like(h_ref)
        c_ref[...] = jnp.zeros_like(c_ref)

        def step(i, _):
            h = h_ref[...]                                   # (Bb, NH) f32
            c = c_ref[...]
            h_bf = h.astype(jnp.bfloat16)

            # additive attention: e = score(tanh(i2h(H) + h2h(h)))
            hproj = (jnp.dot(h_bf, w_h2h, preferred_element_type=jnp.float32)
                     + b_h2h)                                # (Bb, NH) f32
            tanhed = jnp.tanh(proj + hproj.astype(cdt)[:, None, :])     # (Bb, T, NH)
            e = jnp.sum(tanhed * w_score_bc, axis=-1)                   # (Bb, T)

            # softmax over T; sum/reciprocal kept in f32
            e = e - jnp.max(e, axis=-1, keepdims=True)
            p = jnp.exp(e)
            l = jnp.sum(p.astype(jnp.float32), axis=-1, keepdims=True)
            alpha = p.astype(jnp.float32) * pl.reciprocal(l, approx=True)

            # context = bmm(alpha^T, batch_H) on the MXU
            context = jnp.einsum('bqt,btc->bqc',
                                 alpha[:, None, :].astype(jnp.bfloat16), bH,
                                 preferred_element_type=jnp.float32)[:, 0, :]   # (Bb, C)

            # LSTMCell on concat([context, onehot]); the onehot @ W_ih term is the
            # pre-gathered bf16 embedding row emb_ref[i].
            gates = (jnp.dot(context.astype(jnp.bfloat16), w_ih_ctx,
                             preferred_element_type=jnp.float32)
                     + emb_ref[i]
                     + jnp.dot(h_bf, w_hh, preferred_element_type=jnp.float32)
                     + b_lstm)                               # (Bb, 4*NH) f32
            i_g = jax.nn.sigmoid(gates[:, 0:NH])
            f_g = jax.nn.sigmoid(gates[:, NH:2 * NH])
            g_g = jnp.tanh(gates[:, 2 * NH:3 * NH])
            o_g = jax.nn.sigmoid(gates[:, 3 * NH:4 * NH])
            c_new = f_g * c + i_g * g_g
            h_new = o_g * jnp.tanh(c_new)
            h_ref[...] = h_new
            c_ref[...] = c_new

            # generator(hidden) -> per-step logits; class dim padded to 128 lanes
            probs_ref[i] = (jnp.dot(h_new.astype(jnp.bfloat16), w_gen,
                                    preferred_element_type=jnp.float32) + b_gen)
            return 0

        # steps are serially dependent -> partial unroll keeps vreg pressure bounded
        jax.lax.fori_loop(0, num_steps, step, 0, unroll=2)

    return kernel


def attention_decode_train(batch_H, text, pp, num_classes):
    """batch_H: (B, T, C) bf16; text: (B, num_steps) int32 -> (B, num_steps, nclass) f32."""
    B, T, C = batch_H.shape
    num_steps = text.shape[1]
    nh = pp["nh"]
    nclass_pad = pp["nclass_pad"]

    batch_H = batch_H.astype(jnp.bfloat16)                   # no-op when conv already bf16
    # one_hot(text) @ W_ih_oh is a row gather -> per-step embeddings, bf16
    emb = jnp.transpose(pp["w_ih_oh"][text], (1, 0, 2))      # (steps, B, 4nh) bf16

    # Batch split across TensorCores only on multi-TC chips (and only when big enough);
    # on single-TC v5e/v6e the grid is a serial loop, so keep one block.
    if _MULTI_TC and B >= 16:
        Bp = _round_up(B, 16)
        bblk = Bp // 2
    else:
        Bp, bblk = B, B
    if Bp != B:
        batch_H = jnp.pad(batch_H, ((0, Bp - B), (0, 0), (0, 0)))
        emb = jnp.pad(emb, ((0, 0), (0, Bp - B), (0, 0)))
    grid = (Bp // bblk,)

    attn_bf16 = not _IS_V5E
    cbytes = 2 if attn_bf16 else 4

    need = (2 * bblk * T * C * 2                      # batch_H block (bf16, dbl-buffered)
            + 2 * num_steps * bblk * 4 * nh * 2       # emb block (bf16)
            + C * nh * 2 + nh * nh * 2 + 4 * nh * 4 + nh * 4
            + C * 4 * nh * 2 + nh * 4 * nh * 2 + 4 * nh * 4
            + nh * nclass_pad * 2 + nclass_pad * 4
            + 2 * num_steps * bblk * nclass_pad * 4   # probs block
            + 2 * bblk * nh * 4                       # h/c scratch
            + 3 * bblk * T * nh * cbytes              # proj + tanh/score temporaries
            + bblk * T * 4)
    # TODO(synk): if batch_H + proj + tanh temporaries approach the VMEM limit at
    # production T/NH, tile T inside the kernel with an online softmax (flash-style).

    probs = pl.pallas_call(
        _make_decoder_kernel(attn_bf16),
        out_shape=jax.ShapeDtypeStruct((num_steps, Bp, nclass_pad), jnp.float32),
        grid=grid,
        in_specs=[
            pl.BlockSpec((bblk, T, C), lambda b: (b, 0, 0)),
            pl.BlockSpec((num_steps, bblk, 4 * nh), lambda b: (0, b, 0)),
            pl.BlockSpec((C, nh), lambda b: (0, 0)),
            pl.BlockSpec((nh, nh), lambda b: (0, 0)),
            pl.BlockSpec((1, nh), lambda b: (0, 0)),
            pl.BlockSpec((1, nh), lambda b: (0, 0)),
            pl.BlockSpec((C, 4 * nh), lambda b: (0, 0)),
            pl.BlockSpec((nh, 4 * nh), lambda b: (0, 0)),
            pl.BlockSpec((1, 4 * nh), lambda b: (0, 0)),
            pl.BlockSpec((nh, nclass_pad), lambda b: (0, 0)),
            pl.BlockSpec((1, nclass_pad), lambda b: (0, 0)),
        ],
        out_specs=pl.BlockSpec((num_steps, bblk, nclass_pad), lambda b: (0, b, 0)),
        scratch_shapes=[pltpu.VMEM((bblk, nh), jnp.float32),
                        pltpu.VMEM((bblk, nh), jnp.float32)],
        compiler_params=pltpu.CompilerParams(
            dimension_semantics=("parallel",),
            vmem_limit_bytes=_vmem_limit(need)),
    )(batch_H, emb, pp["w_i2h_t"], pp["w_h2h_t"], pp["b_h2h"], pp["w_score"],
      pp["w_ih_ctx"], pp["w_hh_t"], pp["b_lstm"], pp["w_gen_t"], pp["b_gen"])

    probs = probs[:, :B, :num_classes]                # drop batch / lane padding
    return jnp.transpose(probs, (1, 0, 2))            # (B, num_steps, nclass)


# ----------------------------------------------------------------------------------
# Model wrapper mirroring Attn_model
# ----------------------------------------------------------------------------------
class AttnModelPallas:
    FEATURE_CHANNELS = 512

    def __init__(self, imgH, imgW, nc, nclass, nh, key):
        self.nclass = nclass
        self.nh = nh
        C = self.FEATURE_CHANNELS
        ks = jax.random.split(key, 12)

        def u(k, shape, fan_in):
            s = 1.0 / math.sqrt(fan_in)
            return jax.random.uniform(k, shape, jnp.float32, -s, s)

        # TODO(synk): ResNet_FeatureExtractor is substituted by a single conv3x3/s2 + ReLU
        # with the same (b, 512, h', w') interface (its definition is not in the source).
        self.conv_w = u(ks[0], (C, nc, 3, 3), nc * 9)
        self.conv_b = u(ks[1], (C,), nc * 9)

        # Attention / AttentionCell / LSTMCell / generator parameters (PyTorch shapes)
        w_i2h = u(ks[2], (nh, C), C)                     # i2h: Linear(C, nh, bias=False)
        w_h2h = u(ks[3], (nh, nh), nh)                   # h2h: Linear(nh, nh)
        b_h2h = u(ks[4], (nh,), nh)
        w_score = u(ks[5], (1, nh), nh)                  # score: Linear(nh, 1, bias=False)
        w_ih = u(ks[6], (4 * nh, C + nclass), nh)        # LSTMCell
        w_hh = u(ks[7], (4 * nh, nh), nh)
        b_ih = u(ks[8], (4 * nh,), nh)
        b_hh = u(ks[9], (4 * nh,), nh)
        w_gen = u(ks[10], (nclass, nh), nh)              # generator: Linear(nh, nclass)
        b_gen = u(ks[11], (nclass,), nh)

        # per-call weight prep hoisted here (transposes / bf16 casts / lane padding, once)
        nclass_pad = _round_up(nclass, 128)
        w_ih_t = w_ih.T                                  # (C + nclass, 4nh)
        self.prepped = dict(
            nh=nh, nclass_pad=nclass_pad,
            w_i2h_t=w_i2h.T.astype(jnp.bfloat16),
            w_h2h_t=w_h2h.T.astype(jnp.bfloat16),
            b_h2h=b_h2h.reshape(1, nh).astype(jnp.float32),
            w_score=w_score.astype(jnp.float32),
            w_ih_ctx=w_ih_t[:C].astype(jnp.bfloat16),
            w_ih_oh=w_ih_t[C:].astype(jnp.bfloat16),     # gathered per step (== onehot @ W_ih)
            w_hh_t=w_hh.T.astype(jnp.bfloat16),
            b_lstm=(b_ih + b_hh).reshape(1, 4 * nh).astype(jnp.float32),
            w_gen_t=jnp.pad(w_gen.T,
                            ((0, 0), (0, nclass_pad - nclass))).astype(jnp.bfloat16),
            b_gen=jnp.pad(b_gen.reshape(1, nclass),
                          ((0, 0), (0, nclass_pad - nclass))).astype(jnp.float32),
        )

    def __call__(self, x_nchw, text, is_train=True, finetune=False):
        # TODO(synk): only the is_train=True (teacher-forcing) decode branch of the original
        # Attention module is implemented; the greedy-argmax inference branch is omitted.
        visual_feature = conv3x3_s2_relu(x_nchw, self.conv_w, self.conv_b)  # (B, h*w, 512) bf16
        return attention_decode_train(visual_feature, text, self.prepped, self.nclass)


if __name__ == "__main__":
    key = jax.random.PRNGKey(0)
    k_x, k_t, k_p = jax.random.split(key, 3)

    B, nc, H, W = 2, 3, 16, 16      # input image batch (NCHW)
    nclass, nh = 16, 32             # class and hidden sizes
    num_steps = 8                   # == batch_max_length + 1

    x = jax.random.normal(k_x, (B, nc, H, W), jnp.float32)
    text = jax.random.randint(k_t, (B, num_steps), 0, nclass, jnp.int32)

    model = AttnModelPallas(H, W, nc, nclass, nh, k_p)
    out = model(x, text, is_train=True)
    out = jax.block_until_ready(out)

    assert out.shape == (B, num_steps, nclass), out.shape
    assert bool(jnp.all(jnp.isfinite(out)))
    print("KERNEL_OK")
</pallas_src>

<mosaic_0001>
module attributes {stable_mosaic.version = 11 : i64} {
  func.func @kernel(%arg0: i32, %arg1: memref<1x9x9x3xbf16, #tpu.memory_space<vmem>>, %arg2: memref<1x9x9x3xbf16, #tpu.memory_space<vmem>>, %arg3: memref<1x9x9x3xbf16, #tpu.memory_space<vmem>>, %arg4: memref<1x9x9x3xbf16, #tpu.memory_space<vmem>>, %arg5: memref<9x3x512xbf16, #tpu.memory_space<vmem>>, %arg6: memref<1x512xf32, #tpu.memory_space<vmem>>, %arg7: memref<1x64x512xbf16, #tpu.memory_space<vmem>>) attributes {dimension_semantics = [#tpu.dimension_semantics<parallel>], iteration_bounds = array<i64: 2>, scalar_prefetch = 0 : i64, scratch_operands = 0 : i64, tpu.core_type = #tpu.core_type<tc>, window_params = [{transform_indices = @transform_0, window_bounds = array<i64: 1, 9, 9, 3>}, {transform_indices = @transform_1, window_bounds = array<i64: 1, 9, 9, 3>}, {transform_indices = @transform_2, window_bounds = array<i64: 1, 9, 9, 3>}, {transform_indices = @transform_3, window_bounds = array<i64: 1, 9, 9, 3>}, {pipeline_mode = #tpu.pipeline_mode<synchronous>, transform_indices = @transform_4, window_bounds = array<i64: 9, 3, 512>}, {pipeline_mode = #tpu.pipeline_mode<synchronous>, transform_indices = @transform_5, window_bounds = array<i64: 1, 512>}, {transform_indices = @transform_6, window_bounds = array<i64: 1, 64, 512>}]} {
    %cst = arith.constant 0.000000e+00 : f32
    %0 = vector.broadcast %cst : f32 to vector<64x512xf32>
    %c0 = arith.constant 0 : index
    %c0_0 = arith.constant 0 : index
    %c0_1 = arith.constant 0 : index
    %c0_2 = arith.constant 0 : index
    %1 = vector.load %arg1[%c0, %c0_0, %c0_1, %c0_2] : memref<1x9x9x3xbf16, #tpu.memory_space<vmem>>, vector<1x9x9x3xbf16>
    %2 = vector.shape_cast %1 : vector<1x9x9x3xbf16> to vector<9x9x3xbf16>
    %3 = vector.extract_strided_slice %2 {offsets = [0, 0, 0], sizes = [8, 8, 3], strides = [1, 1, 1]} : vector<9x9x3xbf16> to vector<8x8x3xbf16>
    %4 = vector.shape_cast %3 : vector<8x8x3xbf16> to vector<64x3xbf16>
    %c0_3 = arith.constant 0 : index
    %c0_4 = arith.constant 0 : index
    %c0_5 = arith.constant 0 : index
    %5 = vector.load %arg5[%c0_3, %c0_4, %c0_5] : memref<9x3x512xbf16, #tpu.memory_space<vmem>>, vector<1x3x512xbf16>
    %6 = vector.shape_cast %5 : vector<1x3x512xbf16> to vector<3x512xbf16>
    %cst_6 = arith.constant dense<0.000000e+00> : vector<64x512xf32>
    %7 = tpu.matmul %4, %6, %cst_6 {dimension_numbers = #tpu.dot_dimension_numbers<[1], [0], [0], [1], [0, 0, 1, 1], [], []>} : vector<64x3xbf16>, vector<3x512xbf16>, vector<64x512xf32> -> vector<64x512xf32>
    %8 = arith.addf %0, %7 : vector<64x512xf32>
    %c0_7 = arith.constant 0 : index
    %c0_8 = arith.constant 0 : index
    %c0_9 = arith.constant 0 : index
    %c0_10 = arith.constant 0 : index
    %9 = vector.load %arg2[%c0_7, %c0_8, %c0_9, %c0_10] : memref<1x9x9x3xbf16, #tpu.memory_space<vmem>>, vector<1x9x9x3xbf16>
    %10 = vector.shape_cast %9 : vector<1x9x9x3xbf16> to vector<9x9x3xbf16>
    %11 = vector.extract_strided_slice %10 {offsets = [0, 0, 0], sizes = [8, 8, 3], strides = [1, 1, 1]} : vector<9x9x3xbf16> to vector<8x8x3xbf16>
    %12 = vector.shape_cast %11 : vector<8x8x3xbf16> to vector<64x3xbf16>
    %c1 = arith.constant 1 : index
    %c0_11 = arith.constant 0 : index
    %c0_12 = arith.constant 0 : index
    %13 = vector.load %arg5[%c1, %c0_11, %c0_12] : memref<9x3x512xbf16, #tpu.memory_space<vmem>>, vector<1x3x512xbf16>
    %14 = vector.shape_cast %13 : vector<1x3x512xbf16> to vector<3x512xbf16>
    %cst_13 = arith.constant dense<0.000000e+00> : vector<64x512xf32>
    %15 = tpu.matmul %12, %14, %cst_13 {dimension_numbers = #tpu.dot_dimension_numbers<[1], [0], [0], [1], [0, 0, 1, 1], [], []>} : vector<64x3xbf16>, vector<3x512xbf16>, vector<64x512xf32> -> vector<64x512xf32>
    %16 = arith.addf %8, %15 : vector<64x512xf32>
    %c0_14 = arith.constant 0 : index
    %c0_15 = arith.constant 0 : index
    %c0_16 = arith.constant 0 : index
    %c0_17 = arith.constant 0 : index
    %17 = vector.load %arg1[%c0_14, %c0_15, %c0_16, %c0_17] : memref<1x9x9x3xbf16, #tpu.memory_space<vmem>>, vector<1x9x9x3xbf16>
    %18 = vector.shape_cast %17 : vector<1x9x9x3xbf16> to vector<9x9x3xbf16>
    %19 = vector.extract_strided_slice %18 {offsets = [0, 1, 0], sizes = [8, 8, 3], strides = [1, 1, 1]} : vector<9x9x3xbf16> to vector<8x8x3xbf16>
    %20 = vector.shape_cast %19 : vector<8x8x3xbf16> to vector<64x3xbf16>
    %c2 = arith.constant 2 : index
    %c0_18 = arith.constant 0 : index
    %c0_19 = arith.constant 0 : index
    %21 = vector.load %arg5[%c2, %c0_18, %c0_19] : memref<9x3x512xbf16, #tpu.memory_space<vmem>>, vector<1x3x512xbf16>
    %22 = vector.shape_cast %21 : vector<1x3x512xbf16> to vector<3x512xbf16>
    %cst_20 = arith.constant dense<0.000000e+00> : vector<64x512xf32>
    %23 = tpu.matmul %20, %22, %cst_20 {dimension_numbers = #tpu.dot_dimension_numbers<[1], [0], [0], [1], [0, 0, 1, 1], [], []>} : vector<64x3xbf16>, vector<3x512xbf16>, vector<64x512xf32> -> vector<64x512xf32>
    %24 = arith.addf %16, %23 : vector<64x512xf32>
    %c0_21 = arith.constant 0 : index
    %c0_22 = arith.constant 0 : index
    %c0_23 = arith.constant 0 : index
    %c0_24 = arith.constant 0 : index
    %25 = vector.load %arg3[%c0_21, %c0_22, %c0_23, %c0_24] : memref<1x9x9x3xbf16, #tpu.memory_space<vmem>>, vector<1x9x9x3xbf16>
    %26 = vector.shape_cast %25 : vector<1x9x9x3xbf16> to vector<9x9x3xbf16>
    %27 = vector.extract_strided_slice %26 {offsets = [0, 0, 0], sizes = [8, 8, 3], strides = [1, 1, 1]} : vector<9x9x3xbf16> to vector<8x8x3xbf16>
    %28 = vector.shape_cast %27 : vector<8x8x3xbf16> to vector<64x3xbf16>
    %c3 = arith.constant 3 : index
    %c0_25 = arith.constant 0 : index
    %c0_26 = arith.constant 0 : index
    %29 = vector.load %arg5[%c3, %c0_25, %c0_26] : memref<9x3x512xbf16, #tpu.memory_space<vmem>>, vector<1x3x512xbf16>
    %30 = vector.shape_cast %29 : vector<1x3x512xbf16> to vector<3x512xbf16>
    %cst_27 = arith.constant dense<0.000000e+00> : vector<64x512xf32>
    %31 = tpu.matmul %28, %30, %cst_27 {dimension_numbers = #tpu.dot_dimension_numbers<[1], [0], [0], [1], [0, 0, 1, 1], [], []>} : vector<64x3xbf16>, vector<3x512xbf16>, vector<64x512xf32> -> vector<64x512xf32>
    %32 = arith.addf %24, %31 : vector<64x512xf32>
    %c0_28 = arith.constant 0 : index
    %c0_29 = arith.constant 0 : index
    %c0_30 = arith.constant 0 : index
    %c0_31 = arith.constant 0 : index
    %33 = vector.load %arg4[%c0_28, %c0_29, %c0_30, %c0_31] : memref<1x9x9x3xbf16, #tpu.memory_space<vmem>>, vector<1x9x9x3xbf16>
    %34 = vector.shape_cast %33 : vector<1x9x9x3xbf16> to vector<9x9x3xbf16>
    %35 = vector.extract_strided_slice %34 {offsets = [0, 0, 0], sizes = [8, 8, 3], strides = [1, 1, 1]} : vector<9x9x3xbf16> to vector<8x8x3xbf16>
    %36 = vector.shape_cast %35 : vector<8x8x3xbf16> to vector<64x3xbf16>
    %c4 = arith.constant 4 : index
    %c0_32 = arith.constant 0 : index
    %c0_33 = arith.constant 0 : index
    %37 = vector.load %arg5[%c4, %c0_32, %c0_33] : memref<9x3x512xbf16, #tpu.memory_space<vmem>>, vector<1x3x512xbf16>
    %38 = vector.shape_cast %37 : vector<1x3x512xbf16> to vector<3x512xbf16>
    %cst_34 = arith.constant dense<0.000000e+00> : vector<64x512xf32>
    %39 = tpu.matmul %36, %38, %cst_34 {dimension_numbers = #tpu.dot_dimension_numbers<[1], [0], [0], [1], [0, 0, 1, 1], [], []>} : vector<64x3xbf16>, vector<3x512xbf16>, vector<64x512xf32> -> vector<64x512xf32>
    %40 = arith.addf %32, %39 : vector<64x512xf32>
    %c0_35 = arith.constant 0 : index
    %c0_36 = arith.constant 0 : index
    %c0_37 = arith.constant 0 : index
    %c0_38 = arith.constant 0 : index
    %41 = vector.load %arg3[%c0_35, %c0_36, %c0_37, %c0_38] : memref<1x9x9x3xbf16, #tpu.memory_space<vmem>>, vector<1x9x9x3xbf16>
    %42 = vector.shape_cast %41 : vector<1x9x9x3xbf16> to vector<9x9x3xbf16>
    %43 = vector.extract_strided_slice %42 {offsets = [0, 1, 0], sizes = [8, 8, 3], strides = [1, 1, 1]} : vector<9x9x3xbf16> to vector<8x8x3xbf16>
    %44 = vector.shape_cast %43 : vector<8x8x3xbf16> to vector<64x3xbf16>
    %c5 = arith.constant 5 : index
    %c0_39 = arith.constant 0 : index
    %c0_40 = arith.constant 0 : index
    %45 = vector.load %arg5[%c5, %c0_39, %c0_40] : memref<9x3x512xbf16, #tpu.memory_space<vmem>>, vector<1x3x512xbf16>
    %46 = vector.shape_cast %45 : vector<1x3x512xbf16> to vector<3x512xbf16>
    %cst_41 = arith.constant dense<0.000000e+00> : vector<64x512xf32>
    %47 = tpu.matmul %44, %46, %cst_41 {dimension_numbers = #tpu.dot_dimension_numbers<[1], [0], [0], [1], [0, 0, 1, 1], [], []>} : vector<64x3xbf16>, vector<3x512xbf16>, vector<64x512xf32> -> vector<64x512xf32>
    %48 = arith.addf %40, %47 : vector<64x512xf32>
    %c0_42 = arith.constant 0 : index
    %c0_43 = arith.constant 0 : index
    %c0_44 = arith.constant 0 : index
    %c0_45 = arith.constant 0 : index
    %49 = vector.load %arg1[%c0_42, %c0_43, %c0_44, %c0_45] : memref<1x9x9x3xbf16, #tpu.memory_space<vmem>>, vector<1x9x9x3xbf16>
    %50 = vector.shape_cast %49 : vector<1x9x9x3xbf16> to vector<9x9x3xbf16>
    %51 = vector.extract_strided_slice %50 {offsets = [1, 0, 0], sizes = [8, 8, 3], strides = [1, 1, 1]} : vector<9x9x3xbf16> to vector<8x8x3xbf16>
    %52 = vector.shape_cast %51 : vector<8x8x3xbf16> to vector<64x3xbf16>
    %c6 = arith.constant 6 : index
    %c0_46 = arith.constant 0 : index
    %c0_47 = arith.constant 0 : index
    %53 = vector.load %arg5[%c6, %c0_46, %c0_47] : memref<9x3x512xbf16, #tpu.memory_space<vmem>>, vector<1x3x512xbf16>
    %54 = vector.shape_cast %53 : vector<1x3x512xbf16> to vector<3x512xbf16>
    %cst_48 = arith.constant dense<0.000000e+00> : vector<64x512xf32>
    %55 = tpu.matmul %52, %54, %cst_48 {dimension_numbers = #tpu.dot_dimension_numbers<[1], [0], [0], [1], [0, 0, 1, 1], [], []>} : vector<64x3xbf16>, vector<3x512xbf16>, vector<64x512xf32> -> vector<64x512xf32>
    %56 = arith.addf %48, %55 : vector<64x512xf32>
    %c0_49 = arith.constant 0 : index
    %c0_50 = arith.constant 0 : index
    %c0_51 = arith.constant 0 : index
    %c0_52 = arith.constant 0 : index
    %57 = vector.load %arg2[%c0_49, %c0_50, %c0_51, %c0_52] : memref<1x9x9x3xbf16, #tpu.memory_space<vmem>>, vector<1x9x9x3xbf16>
    %58 = vector.shape_cast %57 : vector<1x9x9x3xbf16> to vector<9x9x3xbf16>
    %59 = vector.extract_strided_slice %58 {offsets = [1, 0, 0], sizes = [8, 8, 3], strides = [1, 1, 1]} : vector<9x9x3xbf16> to vector<8x8x3xbf16>
    %60 = vector.shape_cast %59 : vector<8x8x3xbf16> to vector<64x3xbf16>
    %c7 = arith.constant 7 : index
    %c0_53 = arith.constant 0 : index
    %c0_54 = arith.constant 0 : index
    %61 = vector.load %arg5[%c7, %c0_53, %c0_54] : memref<9x3x512xbf16, #tpu.memory_space<vmem>>, vector<1x3x512xbf16>
    %62 = vector.shape_cast %61 : vector<1x3x512xbf16> to vector<3x512xbf16>
    %cst_55 = arith.constant dense<0.000000e+00> : vector<64x512xf32>
    %63 = tpu.matmul %60, %62, %cst_55 {dimension_numbers = #tpu.dot_dimension_numbers<[1], [0], [0], [1], [0, 0, 1, 1], [], []>} : vector<64x3xbf16>, vector<3x512xbf16>, vector<64x512xf32> -> vector<64x512xf32>
    %64 = arith.addf %56, %63 : vector<64x512xf32>
    %c0_56 = arith.constant 0 : index
    %c0_57 = arith.constant 0 : index
    %c0_58 = arith.constant 0 : index
    %c0_59 = arith.constant 0 : index
    %65 = vector.load %arg1[%c0_56, %c0_57, %c0_58, %c0_59] : memref<1x9x9x3xbf16, #tpu.memory_space<vmem>>, vector<1x9x9x3xbf16>
    %66 = vector.shape_cast %65 : vector<1x9x9x3xbf16> to vector<9x9x3xbf16>
    %67 = vector.extract_strided_slice %66 {offsets = [1, 1, 0], sizes = [8, 8, 3], strides = [1, 1, 1]} : vector<9x9x3xbf16> to vector<8x8x3xbf16>
    %68 = vector.shape_cast %67 : vector<8x8x3xbf16> to vector<64x3xbf16>
    %c8 = arith.constant 8 : index
    %c0_60 = arith.constant 0 : index
    %c0_61 = arith.constant 0 : index
    %69 = vector.load %arg5[%c8, %c0_60, %c0_61] : memref<9x3x512xbf16, #tpu.memory_space<vmem>>, vector<1x3x512xbf16>
    %70 = vector.shape_cast %69 : vector<1x3x512xbf16> to vector<3x512xbf16>
    %cst_62 = arith.constant dense<0.000000e+00> : vector<64x512xf32>
    %71 = tpu.matmul %68, %70, %cst_62 {dimension_numbers = #tpu.dot_dimension_numbers<[1], [0], [0], [1], [0, 0, 1, 1], [], []>} : vector<64x3xbf16>, vector<3x512xbf16>, vector<64x512xf32> -> vector<64x512xf32>
    %72 = arith.addf %64, %71 : vector<64x512xf32>
    %c0_63 = arith.constant 0 : index
    %c0_64 = arith.constant 0 : index
    %73 = vector.load %arg6[%c0_63, %c0_64] : memref<1x512xf32, #tpu.memory_space<vmem>>, vector<1x512xf32>
    %74 = vector.broadcast %73 : vector<1x512xf32> to vector<64x512xf32>
    %75 = arith.addf %72, %74 : vector<64x512xf32>
    %cst_65 = arith.constant 0.000000e+00 : f32
    %76 = vector.broadcast %cst_65 : f32 to vector<64x512xf32>
    %77 = arith.maximumf %75, %76 : vector<64x512xf32>
    %78 = arith.truncf %77 : vector<64x512xf32> to vector<64x512xbf16>
    %c0_66 = arith.constant 0 : index
    %c0_67 = arith.constant 0 : index
    %c0_68 = arith.constant 0 : index
    %79 = vector.load %arg7[%c0_66, %c0_67, %c0_68] : memref<1x64x512xbf16, #tpu.memory_space<vmem>>, vector<1x64x512xbf16>
    %80 = vector.shape_cast %79 : vector<1x64x512xbf16> to vector<64x512xbf16>
    %81 = vector.shape_cast %78 : vector<64x512xbf16> to vector<1x64x512xbf16>
    tpu.vector_store %arg7[%c0_66, %c0_67, %c0_68], %81 {strides = array<i32>} : memref<1x64x512xbf16, #tpu.memory_space<vmem>>, vector<1x64x512xbf16>,
    return
  }
  func.func @transform_0(%arg0: i32) -> (i32, i32, i32, i32) {
    %c0_i32 = arith.constant 0 : i32
    %c0_i32_0 = arith.constant 0 : i32
    %c0_i32_1 = arith.constant 0 : i32
    %c0_i32_2 = arith.constant 0 : i32
    return %arg0, %c0_i32, %c0_i32_0, %c0_i32_1 : i32, i32, i32, i32
  }
  func.func @transform_1(%arg0: i32) -> (i32, i32, i32, i32) {
    %c0_i32 = arith.constant 0 : i32
    %c0_i32_0 = arith.constant 0 : i32
    %c0_i32_1 = arith.constant 0 : i32
    %c0_i32_2 = arith.constant 0 : i32
    return %arg0, %c0_i32, %c0_i32_0, %c0_i32_1 : i32, i32, i32, i32
  }
  func.func @transform_2(%arg0: i32) -> (i32, i32, i32, i32) {
    %c0_i32 = arith.constant 0 : i32
    %c0_i32_0 = arith.constant 0 : i32
    %c0_i32_1 = arith.constant 0 : i32
    %c0_i32_2 = arith.constant 0 : i32
    return %arg0, %c0_i32, %c0_i32_0, %c0_i32_1 : i32, i32, i32, i32
  }
  func.func @transform_3(%arg0: i32) -> (i32, i32, i32, i32) {
    %c0_i32 = arith.constant 0 : i32
    %c0_i32_0 = arith.constant 0 : i32
    %c0_i32_1 = arith.constant 0 : i32
    %c0_i32_2 = arith.constant 0 : i32
    return %arg0, %c0_i32, %c0_i32_0, %c0_i32_1 : i32, i32, i32, i32
  }
  func.func @transform_4(%arg0: i32) -> (i32, i32, i32) {
    %c0_i32 = arith.constant 0 : i32
    %c0_i32_0 = arith.constant 0 : i32
    %c0_i32_1 = arith.constant 0 : i32
    %c0_i32_2 = arith.constant 0 : i32
    return %c0_i32, %c0_i32_0, %c0_i32_1 : i32, i32, i32
  }
  func.func @transform_5(%arg0: i32) -> (i32, i32) {
    %c0_i32 = arith.constant 0 : i32
    %c0_i32_0 = arith.constant 0 : i32
    %c0_i32_1 = arith.constant 0 : i32
    return %c0_i32, %c0_i32_0 : i32, i32
  }
  func.func @transform_6(%arg0: i32) -> (i32, i32, i32) {
    %c0_i32 = arith.constant 0 : i32
    %c0_i32_0 = arith.constant 0 : i32
    %c0_i32_1 = arith.constant 0 : i32
    return %arg0, %c0_i32, %c0_i32_0 : i32, i32, i32
  }
}

</mosaic_0001>

<bundles_post_ra>
// kernel: tpu_custom_call.1
= control target key start
LH: loop header
LB: loop body
LE: loop exit
PB: predicated region body
PF: predicated region fallthrough
CT: control target
= control target key end

     0   :  { %11 = vsyncpa [#allocation3], 0  ;;  %s4173_s0 = inlined_call_operand.vmem [shape: bf16[2,9,9,3], index: 0, kind: input, shape index: {}]   ;;  %s4174_s1 = inlined_call_operand.vmem [shape: bf16[2,9,9,3], index: 1, kind: input, shape index: {}]   ;;  %s4175_s2 = inlined_call_operand.vmem [shape: bf16[2,9,9,3], index: 2, kind: input, shape index: {}]   ;;  %s4176_s3 = inlined_call_operand.vmem [shape: bf16[2,9,9,3], index: 3, kind: input, shape index: {}]   ;;  %s4177_s4 = inlined_call_operand.vmem [shape: bf16[9,3,512], index: 4, kind: input, shape index: {}]   ;;  %s4178_s5 = inlined_call_operand.vmem [shape: f32[1,512], index: 5, kind: input, shape index: {}]   ;;  %s4179_s6 = inlined_call_operand.hbm [shape: bf16[2,64,512], index: 6, kind: output, shape index: {}]  }
   0x1   :  { %13 = vsyncpa [#allocation3 + $0x1], 0  ;;  %s2820_s21 = smov 0   ;;  %s2822_s22 = smov 0  }
   0x2   :  { %s2824_s23 = smov 0   ;;  %s2826_s24 = smov 0  }
   0x3 LB: > { %s2841_s25 = sadd.s32 4294967295, %s2780_s24   ;;  %s2468_s26 = sadd.s32 4294967294, %s2780_s24   ;;  %s2780_s24 = sphi %s2826_s24, %s4276_s24   ;;  %s2776_s23 = sphi %s2824_s23, %s4275_s23   ;;  %s2772_s22 = sphi %s2822_s22, %s4274_s22   ;;  %s2768_s21 = sphi %s2820_s21, %s4273_s21  }
   0x4   : > { %s2845_s27 = sadd.s32 1, %s2780_s24   ;;  %s172_s28 = sadd.s32 1, %s2776_s23 }
   0x5   : > { %s169_s29 = ssub.s32 %s2780_s24, %s2845_s27  ;;  %p182_p0 = scmp.ne.s32.totalorder %s2776_s23, %s2772_s22 }
   0x6   : > { %p170_p1 = scmp.eq.s32.totalorder %s169_s29, 0  ;;  %p183_p2 = scmp.eq.s32.totalorder %s2841_s25, 1 }
   0x7   : > { %p188_p3 = scmp.ne.s32.totalorder %s2772_s22, %s2768_s21  ;;  %p189_p4 = scmp.eq.s32.totalorder %s2468_s26, 1 }
   0x8   : > { %s2856_s30 = scalar_select %p170_p1, %s2776_s23, %s172_s28  }
   0x9   : > { %p2858_p5 = por %p183_p2, %p182_p0  ;;  %p2862_p6 = por %p189_p4, %p188_p3 }
   0xa   : > { %p2471_p7 = scmp.ge.s32.totalorder %s2780_s24, 1  ;;  %p245_p8 = scmp.lt.s32.totalorder %s2780_s24, 3 }
   0xc   : > { %p246_p9 = pnand %p2471_p7, %p245_p8 }
   0xe   : > { %249 = sbr.rel (%p246_p9) target bundleno = 746 (0x2ea), region = 44 }
  0x13   : > { %v2477_v0 = vld [vmem:[%s4177_s4 + $0x8] sm:$0xff]  ;;  %vm380_vm0 = vcmask 1040384   ;;  %p290_p10 = scmp.lt.s32.totalorder %s2841_s25, 1  ;;  %vm381_vm1 = vcmask 1041408   ;;  %v2782_v1 = vmov 65535   ;;  %v329_v4 = vld [vmem:[%s4177_s4] sm:$0xff] }
  0x14   : > { %362 = vst [vmem:[#allocation1] ss:$4 sm:$0xff] %v2477_v0  ;;  %v382_v2 = vsel %vm380_vm0, 4294967295, %v2782_v1  ;;  %vm367_vm2 = vcmask 23552   ;;  %v2510_v21 = vld [vmem:[%s4177_s4 + $0x10] sm:$0xff]  ;;  %s287_s14 = sand.u32 1, %s2772_s22  }
  0x15   : > { %s291_s11 = scalar_select %p290_p10, %s2841_s25, 1  ;;  %v2875_v3 = vsel %vm381_vm1, %v382_v2, 0  ;;  %vm670_vm3 = vsmask.f32 3328  ;;  %vm671_vm4 = vsmask.f32 7440 }
  0x16   : > { %vm3006_vm5 = vmor %vm670_vm3, %vm671_vm4  ;;  %s2674_s18 = sshll.u32 %s2841_s25, 7  ;;  %s2355_s29 = scalar_lea.sflag [#allocation3], %s287_s14 }
  0x17   : > { %s2873_s12 = smul.u32 72, %s291_s11 }
  0x19   : > { %s2884_s17 = scalar_lea.vmem %s4174_s1, %s2873_s12  ;;  %s2948_s28 = scalar_lea.vmem %s4173_s0, %s2873_s12 }
  0x1a   : > { %v330_v5 = vld [vmem:[%s2884_s17] sm:$0xf]  ;;  %v331_v6 = vld [vmem:[%s2884_s17 + $0x8] sm:$0xf]  ;;  %v332_v7 = vld [vmem:[%s2884_s17 + $0x10] sm:$0xf]  ;;  %s3158_s15 = scalar_lea.vmem %s4175_s2, %s2873_s12  ;;  %s3289_s26 = scalar_lea.vmem %s4176_s3, %s2873_s12 }
  0x1b   : > { %v363_v8 = vld.sshfl [vmem:[#allocation1] sm:$0xff pattern:$0x73625140]  ;;  %v364_v9 = vld.sshfl [vmem:[#allocation1 + $0x8] sm:$0xff pattern:$0x73625140]  ;;  %v349_v10 = vunpack.c.l.b16 %v330_v5  ;;  %v350_v11 = vunpack.c.l.b16 %v331_v6  ;;  %v351_v12 = vunpack.c.l.b16 %v332_v7 }
  0x1c   : > { %v384_v13 = vand.u32 %v2875_v3, %v363_v8  ;;  %v386_v14 = vand.u32 %v2875_v3, %v364_v9  ;;  %v365_v15 = vld.sshfl [vmem:[#allocation1 + $0x10] sm:$0xff pattern:$0x73625140]  ;;  %v366_v16 = vld.sshfl [vmem:[#allocation1 + $0x18] sm:$0xff pattern:$0x73625140] }
  0x1d   : > { %v388_v17 = vand.u32 %v2875_v3, %v365_v15  ;;  %v390_v18 = vand.u32 %v2875_v3, %v366_v16  ;;  %529 = vst [vmem:[#allocation1] ss:$4 sm:$0xff] %v329_v4  ;;  %v357_v19 = vpack.c.b16 %v350_v11, %v349_v10  ;;  %v2893_v20 = vpack.c.b16 %v351_v12, %v350_v11  ;;  %v2907_v30 = vld [vmem:[%s2884_s17 + $0x18] sm:$0xf]  ;;  %v2917_v33 = vld [vmem:[%s2884_s17 + $0x20] sm:$0xf] }
  0x1e   : > { %399 = vmatpush.bf16.msra.mxu0 %v384_v13  ;;  %428 = vmatpush.bf16.msra.mxu1 %v386_v14  ;;  %4206 = vst [vmem:[#allocation6_spill] sm:$0xff] %v2907_v30  ;;  %v4184_v31 = vunpack.c.l.b16 %v2907_v30  ;;  %v2920_v34 = vld [vmem:[%s2884_s17 + $0x28] sm:$0xf]  ;;  %v4183_v35 = vunpack.c.l.b16 %v2917_v33  ;;  %v2937_v46 = vld [vmem:[%s2884_s17 + $0x30] sm:$0xf] }
  0x1f   : > { %4205 = vst [vmem:[#allocation5_spill] sm:$0xff] %v2893_v20  ;;  %457 = vmatpush.bf16.msra.mxu2 %v388_v17  ;;  %486 = vmatpush.bf16.msra.mxu3 %v390_v18  ;;  %v4182_v36 = vunpack.c.l.b16 %v2920_v34  ;;  %v2940_v47 = vld [vmem:[%s2884_s17 + $0x38] sm:$0xf]  ;;  %v4181_v48 = vunpack.c.l.b16 %v2937_v46  ;;  %v313_v51 = vld [vmem:[%s2948_s28 + $0x8] sm:$0xf] }
  0x20   : > { %v358_v32 = vpack.c.b16 %v4184_v31, %v351_v12  ;;  %4207 = vst [vmem:[#allocation7_spill] sm:$0xff] %v2917_v33  ;;  %v4180_v49 = vunpack.c.l.b16 %v2940_v47  ;;  %v315_v52 = vld [vmem:[%s2948_s28 + $0x10] sm:$0xf]  ;;  %v517_v53 = vunpack.c.l.b16 %v313_v51  ;;  %v311_v56 = vld [vmem:[%s2948_s28] sm:$0xf]  ;;  %v688_v2 = vshrl.u32 %v313_v51, 16 }
  0x21   : > { %2478 = vmatmul.msk.bf16.vlgmr.msra.gmra.mxu0 %vm367_vm2, %v357_v19  ;;  %2482 = vmatmul.msk.bf16.vlgmr.msra.gmra.mxu1 %vm367_vm2, %v357_v19  ;;  %4208 = vst [vmem:[#allocation8_spill] sm:$0xff] %v2920_v34  ;;  %v359_v37 = vpack.c.b16 %v4182_v36, %v4183_v35  ;;  %v518_v54 = vunpack.c.l.b16 %v315_v52  ;;  %v516_v57 = vunpack.c.l.b16 %v311_v56  ;;  %v2968_v59 = vld [vmem:[%s2948_s28 + $0x18] sm:$0xf]  ;;  %v2978_v62 = vld [vmem:[%s2948_s28 + $0x20] sm:$0xf]  ;;  %v691_v4 = vshll.u32 %v313_v51, 16 }
  0x22   : > { %2486 = vmatmul.msk.bf16.vlgmr.msra.gmra.mxu2 %vm367_vm2, %v357_v19  ;;  %2490 = vmatmul.msk.bf16.vlgmr.msra.gmra.mxu3 %vm367_vm2, %v357_v19  ;;  %4209 = vst [vmem:[#allocation9_spill] sm:$0xff] %v2937_v46  ;;  %v360_v50 = vpack.c.b16 %v4180_v49, %v4181_v48  ;;  %v4189_v60 = vunpack.c.l.b16 %v2968_v59  ;;  %v2981_v63 = vld [vmem:[%s2948_s28 + $0x28] sm:$0xf]  ;;  %v4188_v0 = vunpack.c.l.b16 %v2978_v62  ;;  %v690_v6 = vrot.slane %v688_v2, 4  ;;  %v314_v10 = vld [vmem:[%s2948_s28 + $0xc] sm:$0x1] }
  0x23   : > { %4210 = vst [vmem:[#allocation10_spill] sm:$0xff] %v2940_v47  ;;  %v2960_v55 = vpack.c.b16 %v518_v54, %v517_v53  ;;  %v524_v58 = vpack.c.b16 %v517_v53, %v516_v57  ;;  %v4187_v1 = vunpack.c.l.b16 %v2981_v63  ;;  %v693_v7 = vrot.slane %v691_v4, 5  ;;  %v2995_v16 = vld [vmem:[%s2948_s28 + $0x30] sm:$0xf]  ;;  %v2998_v17 = vld [vmem:[%s2948_s28 + $0x38] sm:$0xf] }
  0x24   : > { %v532_v22 = vld.sshfl [vmem:[#allocation1 + $0x10] sm:$0xff pattern:$0x73625140]  ;;  %v533_v23 = vld.sshfl [vmem:[#allocation1 + $0x18] sm:$0xff pattern:$0x73625140]  ;;  %v525_v61 = vpack.c.b16 %v4189_v60, %v518_v54 }
  0x25   : > { %v550_v24 = vand.u32 %v532_v22, %v2875_v3  ;;  %v552_v25 = vand.u32 %v533_v23, %v2875_v3  ;;  %v530_v26 = vld.sshfl [vmem:[#allocation1] sm:$0xff pattern:$0x73625140]  ;;  %v531_v27 = vld.sshfl [vmem:[#allocation1 + $0x8] sm:$0xff pattern:$0x73625140]  ;;  %v526_v5 = vpack.c.b16 %v4187_v1, %v4188_v0  ;;  %v694_v12 = vor.u32 %v693_v7, %v690_v6 }
  0x26   : > { %v546_v28 = vand.u32 %v530_v26, %v2875_v3  ;;  %v548_v29 = vand.u32 %v531_v27, %v2875_v3  ;;  %800 = vst [vmem:[#allocation1] ss:$4 sm:$0xff] %v2510_v21  ;;  %v702_v8 = vshrl.u32 %v315_v52, 16  ;;  %v705_v9 = vshll.u32 %v315_v52, 16  ;;  %v2527_v19 = vld [vmem:[%s4177_s4 + $0x18] sm:$0xff] }
  0x27   : > { %619 = vmatpush.bf16.msrb.mxu2 %v550_v24  ;;  %648 = vmatpush.bf16.msrb.mxu3 %v552_v25  ;;  %v674_v11 = vshrl.u32 %v311_v56, 16  ;;  %v697_v13 = vshll.u32 %v314_v10, 16  ;;  %4211 = vst [vmem:[#allocation11_spill] sm:$0xff] %v2998_v17  ;;  %v677_v18 = vshll.u32 %v311_v56, 16  ;;  %v695_v21 = vrot.slane %v694_v12, 4 }
  0x28   : > { %561 = vmatpush.bf16.msrb.mxu0 %v546_v28  ;;  %590 = vmatpush.bf16.msrb.mxu1 %v548_v29  ;;  %v704_v14 = vrot.slane %v702_v8, 4  ;;  %v707_v15 = vrot.slane %v705_v9, 5  ;;  %v316_v23 = vld [vmem:[%s2948_s28 + $0x14] sm:$0x1]  ;;  %v4186_v24 = vunpack.c.l.b16 %v2995_v16  ;;  %v4185_v25 = vunpack.c.l.b16 %v2998_v17  ;;  %v318_v12 = vld [vmem:[%s2948_s28 + $0x1c] sm:$0x1] }
  0x29   : > { %v699_v22 = vrot.slane %v697_v13, 5  ;;  %v711_v28 = vshll.u32 %v316_v23, 16  ;;  %v676_v29 = vrot.slane %v674_v11, 4  ;;  %v716_v6 = vshrl.u32 %v2968_v59, 16  ;;  %v2534_v1 = vld [vmem:[%s3158_s15 + $0x10] sm:$0xf] }
  0x2a   : > { %v708_v27 = vor.u32 %v707_v15, %v704_v14  ;;  %v719_v7 = vshll.u32 %v2968_v59, 16  ;;  %v730_v23 = vshrl.u32 %v2978_v62, 16  ;;  %v2667_v0 = vld [vmem:[%s3158_s15 + $0x14] sm:$0xf0] }
  0x2b   : > { %v718_v10 = vrot.slane %v716_v6, 4 }
  0x2c   : > { %v721_v11 = vrot.slane %v719_v7, 5 }
  0x2d   : > { %v803_v38 = vld.sshfl [vmem:[#allocation1 + $0x10] sm:$0xff pattern:$0x73625140]  ;;  %v804_v39 = vld.sshfl [vmem:[#allocation1 + $0x18] sm:$0xff pattern:$0x73625140] }
  0x2e   : > { %v821_v40 = vand.u32 %v803_v38, %v2875_v3  ;;  %v823_v41 = vand.u32 %v804_v39, %v2875_v3  ;;  %v801_v42 = vld.sshfl [vmem:[#allocation1] sm:$0xff pattern:$0x73625140]  ;;  %v802_v43 = vld.sshfl [vmem:[#allocation1 + $0x8] sm:$0xff pattern:$0x73625140] }
  0x2f   : > { %v817_v44 = vand.u32 %v801_v42, %v2875_v3  ;;  %v819_v45 = vand.u32 %v802_v43, %v2875_v3  ;;  %1012 = vst [vmem:[#allocation1] ss:$4 sm:$0xff] %v2527_v19  ;;  %v709_v38 = vrot.slane %v708_v27, 4  ;;  %v713_v39 = vrot.slane %v711_v28, 5 }
  0x30   : > { %890 = vmatpush.bf16.msra.mxu2 %v821_v40  ;;  %919 = vmatpush.bf16.msra.mxu3 %v823_v41  ;;  %v700_v40 = vsel %vm3006_vm5, %v695_v21, %v699_v22  ;;  %v527_v41 = vpack.c.b16 %v4185_v25, %v4186_v24  ;;  %v725_v19 = vshll.u32 %v318_v12, 16 }
  0x31   : > { %2479 = vmatmul.msk.bf16.gmra.mxu0 %vm367_vm2, %v358_v32  ;;  %2483 = vmatmul.msk.bf16.gmra.mxu1 %vm367_vm2, %v358_v32  ;;  %v714_v43 = vsel %vm3006_vm5, %v709_v38, %v713_v39  ;;  %v788_v51 = vunpack.c.l.b16 %v700_v40 }
  0x32   : > { %2487 = vmatmul.msk.bf16.gmra.mxu2 %vm367_vm2, %v358_v32  ;;  %2491 = vmatmul.msk.bf16.gmra.mxu3 %vm367_vm2, %v358_v32  ;;  %v679_v32 = vrot.slane %v677_v18, 5  ;;  %v789_v57 = vunpack.c.l.b16 %v714_v43  ;;  %v722_v18 = vor.u32 %v721_v11, %v718_v10  ;;  %v727_v22 = vrot.slane %v725_v19, 5 }
  0x33   : > { %832 = vmatpush.bf16.msra.mxu0 %v817_v44  ;;  %861 = vmatpush.bf16.msra.mxu1 %v819_v45  ;;  %v758_v10 = vshrl.u32 %v2995_v16, 16  ;;  %v761_v11 = vshll.u32 %v2995_v16, 16  ;;  %v775_v19 = vshll.u32 %v2998_v17, 16 }
  0x34   : > { %v680_v44 = vor.u32 %v679_v32, %v676_v29  ;;  %v3025_v2 = vpack.c.b16 %v789_v57, %v788_v51  ;;  %v723_v21 = vrot.slane %v722_v18, 4  ;;  %v733_v29 = vshll.u32 %v2978_v62, 16 }
  0x35   : > { %v744_v32 = vshrl.u32 %v2981_v63, 16  ;;  %v772_v18 = vshrl.u32 %v2998_v17, 16 }
  0x36   : > { %v1015_v45 = vld.sshfl [vmem:[#allocation1 + $0x10] sm:$0xff pattern:$0x73625140]  ;;  %v1013_v54 = vld.sshfl [vmem:[#allocation1] sm:$0xff pattern:$0x73625140]  ;;  %v728_v40 = vsel %vm3006_vm5, %v723_v21, %v727_v22 }
  0x37   : > { %v1033_v52 = vand.u32 %v1015_v45, %v2875_v3  ;;  %v1014_v56 = vld.sshfl [vmem:[#allocation1 + $0x8] sm:$0xff pattern:$0x73625140]  ;;  %4214 = vst [vmem:[#allocation12_spill] sm:$0xff] %v3025_v2  ;;  %v681_v4 = vrot.slane %v680_v44, 4  ;;  %v735_v43 = vrot.slane %v733_v29, 5 }
  0x38   : > { %v746_v44 = vrot.slane %v744_v32, 4  ;;  %v976_v2 = vld [vmem:[%s3158_s15 + $0xc] sm:$0x1] }
  0x39   : > { %v1413_v34 = vshll.u32 %v976_v2, 16 }
  0x41   : > { %2480 = vmatmul.msk.bf16.gmra.mxu0 %vm367_vm2, %v359_v37  ;;  %2484 = vmatmul.msk.bf16.gmra.mxu1 %vm367_vm2, %v359_v37 }
  0x42   : > { %2488 = vmatmul.msk.bf16.gmra.mxu2 %vm367_vm2, %v359_v37  ;;  %2492 = vmatmul.msk.bf16.gmra.mxu3 %vm367_vm2, %v359_v37  ;;  %v312_v37 = vld [vmem:[%s2948_s28 + $0x4] sm:$0x1] }
  0x43   : > { %v683_v42 = vshll.u32 %v312_v37, 16  ;;  %v747_v37 = vshll.u32 %v2981_v63, 16 }
  0x45   : > { %v749_v45 = vrot.slane %v747_v37, 5 }
  0x51   : > { %2481 = vmatmul.msk.bf16.gmra.mxu0 %vm367_vm2, %v360_v50  ;;  %2485 = vmatmul.msk.bf16.gmra.mxu1 %vm367_vm2, %v360_v50 }
  0x52   : > { %2489 = vmatmul.msk.bf16.gmra.mxu2 %vm367_vm2, %v360_v50  ;;  %2493 = vmatmul.msk.bf16.gmra.mxu3 %vm367_vm2, %v360_v50  ;;  %v1016_v50 = vld.sshfl [vmem:[#allocation1 + $0x18] sm:$0xff pattern:$0x73625140] }
  0x53   : > { %v1035_v53 = vand.u32 %v1016_v50, %v2875_v3  ;;  %v320_v50 = vld [vmem:[%s2948_s28 + $0x24] sm:$0x1] }
  0x61   : > { %2494 = vmatmul.msk.bf16.vlgmr.msrb.gmra.mxu0 %vm367_vm2, %v524_v58  ;;  %2498 = vmatmul.msk.bf16.vlgmr.msrb.gmra.mxu1 %vm367_vm2, %v524_v58 }
  0x62   : > { %2502 = vmatmul.msk.bf16.vlgmr.msrb.gmra.mxu2 %vm367_vm2, %v524_v58  ;;  %2506 = vmatmul.msk.bf16.vlgmr.msrb.gmra.mxu3 %vm367_vm2, %v524_v58  ;;  %v1029_v58 = vand.u32 %v1013_v54, %v2875_v3 }
  0x63   : > { %1102 = vmatpush.bf16.msrb.mxu2 %v1033_v52  ;;  %1131 = vmatpush.bf16.msrb.mxu3 %v1035_v53 }
  0x64   : > { %1044 = vmatpush.bf16.msrb.mxu0 %v1029_v58 }
  0x71   : > { %2495 = vmatmul.msk.bf16.gmra.mxu0 %vm367_vm2, %v525_v61  ;;  %2499 = vmatmul.msk.bf16.gmra.mxu1 %vm367_vm2, %v525_v61 }
  0x72   : > { %2503 = vmatmul.msk.bf16.gmra.mxu2 %vm367_vm2, %v525_v61  ;;  %2507 = vmatmul.msk.bf16.gmra.mxu3 %vm367_vm2, %v525_v61  ;;  %v1031_v61 = vand.u32 %v1014_v56, %v2875_v3 }
  0x74   : > { %1073 = vmatpush.bf16.msrb.mxu1 %v1031_v61 }
  0x81   : > { %2496 = vmatmul.msk.bf16.gmra.mxu0 %vm367_vm2, %v526_v5  ;;  %2500 = vmatmul.msk.bf16.gmra.mxu1 %vm367_vm2, %v526_v5 }
  0x82   : > { %2504 = vmatmul.msk.bf16.gmra.mxu2 %vm367_vm2, %v526_v5  ;;  %2508 = vmatmul.msk.bf16.gmra.mxu3 %vm367_vm2, %v526_v5  ;;  %v685_v5 = vrot.slane %v683_v42, 5  ;;  %v732_v42 = vrot.slane %v730_v23, 4 }
  0x84   : > { %v686_v8 = vsel %vm3006_vm5, %v681_v4, %v685_v5  ;;  %v736_v61 = vor.u32 %v735_v43, %v732_v42  ;;  %v739_v4 = vshll.u32 %v320_v50, 16  ;;  %v750_v5 = vor.u32 %v749_v45, %v746_v44  ;;  %v324_v45 = vld [vmem:[%s2948_s28 + $0x34] sm:$0x1]  ;;  %v326_v50 = vld [vmem:[%s2948_s28 + $0x3c] sm:$0x1] }
  0x85   : > { %v787_v9 = vunpack.c.l.b16 %v686_v8  ;;  %v763_v42 = vrot.slane %v761_v11, 5  ;;  %v774_v43 = vrot.slane %v772_v18, 4  ;;  %v777_v44 = vrot.slane %v775_v19, 5 }
  0x86   : > { %v737_v7 = vrot.slane %v736_v61, 4  ;;  %v741_v8 = vrot.slane %v739_v4, 5 }
  0x87   : > { %v795_v13 = vpack.c.b16 %v788_v51, %v787_v9  ;;  %v322_v51 = vld [vmem:[%s2948_s28 + $0x2c] sm:$0x1]  ;;  %v751_v9 = vrot.slane %v750_v5, 4 }
  0x88   : > { %v753_v6 = vshll.u32 %v322_v51, 16  ;;  %v742_v23 = vsel %vm3006_vm5, %v737_v7, %v741_v8  ;;  %v767_v7 = vshll.u32 %v324_v45, 16  ;;  %v778_v8 = vor.u32 %v777_v44, %v774_v43  ;;  %v2560_v44 = vld [vmem:[%s4177_s4 + $0x20] sm:$0xff] }
  0x89   : > { %v3089_v32 = vunpack.c.l.b16 %v742_v23  ;;  %1216 = vst [vmem:[#allocation1] ss:$4 sm:$0xff] %v2560_v44 }
  0x8a   : > { %v779_v11 = vrot.slane %v778_v8, 4 }
  0x8b   : > { %4216 = vst [vmem:[#allocation14_spill] sm:$0xff] %v3089_v32 }
  0x91   : > { %2497 = vmatmul.msk.bf16.gmra.mxu0 %vm367_vm2, %v527_v41  ;;  %2501 = vmatmul.msk.bf16.gmra.mxu1 %vm367_vm2, %v527_v41 }
  0x92   : > { %2505 = vmatmul.msk.bf16.gmra.mxu2 %vm367_vm2, %v527_v41  ;;  %2509 = vmatmul.msk.bf16.gmra.mxu3 %vm367_vm2, %v527_v41  ;;  %v3056_v41 = vunpack.c.l.b16 %v728_v40  ;;  %v760_v40 = vrot.slane %v758_v10, 4  ;;  %v769_v10 = vrot.slane %v767_v7, 5 }
  0x94   : > { %4215 = vst [vmem:[#allocation13_spill] sm:$0xff] %v3056_v41  ;;  %v796_v54 = vpack.c.b16 %v3056_v41, %v789_v57  ;;  %v755_v57 = vrot.slane %v753_v6, 5  ;;  %v764_v6 = vor.u32 %v763_v42, %v760_v40 }
  0x96   : > { %v756_v29 = vsel %vm3006_vm5, %v751_v9, %v755_v57  ;;  %v781_v9 = vshll.u32 %v326_v50, 16  ;;  %v765_v57 = vrot.slane %v764_v6, 4 }
  0x97   : > { %v3091_v37 = vunpack.c.l.b16 %v756_v29 }
  0x98   : > { %v783_v18 = vrot.slane %v781_v9, 5  ;;  %v770_v42 = vsel %vm3006_vm5, %v765_v57, %v769_v10  ;;  %v1219_v57 = vld.sshfl [vmem:[#allocation1 + $0x10] sm:$0xff pattern:$0x73625140] }
  0x99   : > { %4217 = vst [vmem:[#allocation15_spill] sm:$0xff] %v3091_v37  ;;  %v797_v61 = vpack.c.b16 %v3091_v37, %v3089_v32  ;;  %v3124_v45 = vunpack.c.l.b16 %v770_v42  ;;  %v1220_v10 = vld.sshfl [vmem:[#allocation1 + $0x18] sm:$0xff pattern:$0x73625140]  ;;  %v974_v37 = vld [vmem:[%s3158_s15 + $0x4] sm:$0x1] }
  0x9a   : > { %v784_v43 = vsel %vm3006_vm5, %v779_v11, %v783_v18  ;;  %v1237_v11 = vand.u32 %v1219_v57, %v2875_v3  ;;  %v1239_v18 = vand.u32 %v1220_v10, %v2875_v3  ;;  %v1217_v42 = vld.sshfl [vmem:[#allocation1] sm:$0xff pattern:$0x73625140]  ;;  %v1399_v46 = vshll.u32 %v974_v37, 16 }
  0x9b   : > { %4218 = vst [vmem:[#allocation16_spill] sm:$0xff] %v3124_v45  ;;  %v3126_v50 = vunpack.c.l.b16 %v784_v43  ;;  %v1218_v43 = vld.sshfl [vmem:[#allocation1 + $0x8] sm:$0xff pattern:$0x73625140]  ;;  %v1233_v44 = vand.u32 %v1217_v42, %v2875_v3 }
  0x9c   : > { %v1235_v49 = vand.u32 %v1218_v43, %v2875_v3 }
  0x9d   : > { %4219 = vst [vmem:[#allocation17_spill] sm:$0xff] %v3126_v50  ;;  %v798_v7 = vpack.c.b16 %v3126_v50, %v3124_v45  ;;  %v2535_v50 = vor.u32 %v2667_v0, %v2534_v1 }
  0x9e   : > { %v3034_v14 = vpop.f32.mrf.mxu0  ;;  %v3036_v15 = vpop.f32.mrf.mxu1 }
  0xa1   : > { %2511 = vmatmul.msk.bf16.vlgmr.msra.gmra.mxu0 %vm367_vm2, %v795_v13  ;;  %2515 = vmatmul.msk.bf16.vlgmr.msra.gmra.mxu1 %vm367_vm2, %v795_v13 }
  0xa2   : > { %2519 = vmatmul.msk.bf16.vlgmr.msra.gmra.mxu2 %vm367_vm2, %v795_v13  ;;  %2523 = vmatmul.msk.bf16.vlgmr.msra.gmra.mxu3 %vm367_vm2, %v795_v13 }
  0xa3   : > { %1306 = vmatpush.bf16.msra.mxu2 %v1237_v11  ;;  %1335 = vmatpush.bf16.msra.mxu3 %v1239_v18  ;;  %v2666_v11 = vld [vmem:[%s3158_s15 + $0x4] sm:$0xf0] }
  0xa4   : > { %1248 = vmatpush.bf16.msra.mxu0 %v1233_v44  ;;  %1277 = vmatpush.bf16.msra.mxu1 %v1235_v49 }
  0xa5   : > { %v3043_v27 = vpop.f32.mrf.mxu2  ;;  %v3045_v28 = vpop.f32.mrf.mxu3 }
  0xa6   : > { %v3050_v38 = vpop.f32.mrf.mxu0  ;;  %v3052_v39 = vpop.f32.mrf.mxu1 }
  0xad   : > { %v3060_v52 = vpop.f32.mrf.mxu2  ;;  %v3062_v53 = vpop.f32.mrf.mxu3 }
  0xae   : > { %v3065_v56 = vpop.f32.mrf.mxu0  ;;  %v3067_v58 = vpop.f32.mrf.mxu1 }
  0xb1   : > { %2512 = vmatmul.msk.bf16.gmra.mxu0 %vm367_vm2, %v796_v54  ;;  %2516 = vmatmul.msk.bf16.gmra.mxu1 %vm367_vm2, %v796_v54 }
  0xb2   : > { %2520 = vmatmul.msk.bf16.gmra.mxu2 %vm367_vm2, %v796_v54  ;;  %2524 = vmatmul.msk.bf16.gmra.mxu3 %vm367_vm2, %v796_v54 }
  0xb5   : > { %v3075_v12 = vpop.f32.mrf.mxu2  ;;  %v3077_v13 = vpop.f32.mrf.mxu3 }
  0xb6   : > { %v3081_v21 = vpop.f32.mrf.mxu0  ;;  %v3083_v22 = vpop.f32.mrf.mxu1 }
  0xbd   : > { %v3095_v51 = vpop.f32.mrf.mxu2  ;;  %v3097_v54 = vpop.f32.mrf.mxu3 }
  0xbe   : > { %v3101_v4 = vpop.f32.mrf.mxu0  ;;  %v3103_v5 = vpop.f32.mrf.mxu1 }
  0xc1   : > { %2513 = vmatmul.msk.bf16.gmra.mxu0 %vm367_vm2, %v797_v61  ;;  %2517 = vmatmul.msk.bf16.gmra.mxu1 %vm367_vm2, %v797_v61 }
  0xc2   : > { %2521 = vmatmul.msk.bf16.gmra.mxu2 %vm367_vm2, %v797_v61  ;;  %2525 = vmatmul.msk.bf16.gmra.mxu3 %vm367_vm2, %v797_v61 }
  0xc5   : > { %v3109_v19 = vpop.f32.mrf.mxu2  ;;  %v3111_v23 = vpop.f32.mrf.mxu3 }
  0xc6   : > { %v3113_v29 = vpop.f32.mrf.mxu0  ;;  %v3115_v40 = vpop.f32.mrf.mxu1 }
  0xcd   : > { %v3128_v61 = vpop.f32.mrf.mxu2  ;;  %v3130_v6 = vpop.f32.mrf.mxu3 }
  0xce   : > { %v3134_v8 = vpop.f32.mrf.mxu0  ;;  %v3136_v9 = vpop.f32.mrf.mxu1 }
  0xd1   : > { %2514 = vmatmul.msk.bf16.gmra.mxu0 %vm367_vm2, %v798_v7  ;;  %2518 = vmatmul.msk.bf16.gmra.mxu1 %vm367_vm2, %v798_v7 }
  0xd2   : > { %2522 = vmatmul.msk.bf16.gmra.mxu2 %vm367_vm2, %v798_v7  ;;  %2526 = vmatmul.msk.bf16.gmra.mxu3 %vm367_vm2, %v798_v7  ;;  %v2530_v7 = vld [vmem:[%s3158_s15] sm:$0xf] }
  0xd3   : > { %v2531_v42 = vor.u32 %v2666_v11, %v2530_v7 }
  0xd5   : > { %v3146_v57 = vpop.f32.mrf.mxu2  ;;  %v3148_v10 = vpop.f32.mrf.mxu3 }
  0xd6   : > { %v3150_v48 = vpop.f32.mrf.mxu0  ;;  %v3152_v36 = vpop.f32.mrf.mxu1 }
  0xdd   : > { %v3162_v18 = vpop.f32.mrf.mxu2  ;;  %v3164_v49 = vpop.f32.mrf.mxu3 }
  0xde   : > { %v563_v43 = vpop.f32.mrf.mxu0  ;;  %v592_v44 = vpop.f32.mrf.mxu1 }
  0xdf   : > { %v3167_v35 = vadd.f32 %v563_v43, %v3034_v14  ;;  %v3170_v31 = vadd.f32 %v592_v44, %v3036_v15 }
  0xe1   : > { %2544 = vmatmul.msk.bf16.vlgmr.msrb.gmra.mxu0 %vm367_vm2, %v2531_v42  ;;  %2548 = vmatmul.msk.bf16.vlgmr.msrb.gmra.mxu1 %vm367_vm2, %v2531_v42 }
  0xe2   : > { %2552 = vmatmul.msk.bf16.vlgmr.msrb.gmra.mxu2 %vm367_vm2, %v2531_v42  ;;  %2556 = vmatmul.msk.bf16.vlgmr.msrb.gmra.mxu3 %vm367_vm2, %v2531_v42 }
  0xe5   : > { %v621_v25 = vpop.f32.mrf.mxu2  ;;  %v650_v7 = vpop.f32.mrf.mxu3 }
  0xe6   : > { %v3177_v11 = vadd.f32 %v621_v25, %v3043_v27  ;;  %v3180_v24 = vadd.f32 %v650_v7, %v3045_v28  ;;  %v565_v14 = vpop.f32.mrf.mxu0  ;;  %v594_v43 = vpop.f32.mrf.mxu1 }
  0xe7   : > { %v3183_v15 = vadd.f32 %v565_v14, %v3050_v38  ;;  %v3186_v44 = vadd.f32 %v594_v43, %v3052_v39  ;;  %v2538_v14 = vld [vmem:[%s3158_s15 + $0x20] sm:$0xf]  ;;  %v2668_v43 = vld [vmem:[%s3158_s15 + $0x24] sm:$0xf0] }
  0xed   : > { %v623_v60 = vpop.f32.mrf.mxu2  ;;  %v652_v42 = vpop.f32.mrf.mxu3 }
  0xee   : > { %v3191_v45 = vadd.f32 %v623_v60, %v3060_v52  ;;  %v3194_v25 = vadd.f32 %v652_v42, %v3062_v53  ;;  %v568_v27 = vpop.f32.mrf.mxu0  ;;  %v597_v28 = vpop.f32.mrf.mxu1 }
  0xef   : > { %v3197_v38 = vadd.f32 %v568_v27, %v3065_v56  ;;  %v3200_v39 = vadd.f32 %v597_v28, %v3067_v58  ;;  %v2539_v27 = vor.u32 %v2668_v43, %v2538_v14  ;;  %v2593_v43 = vld [vmem:[%s4177_s4 + $0x28] sm:$0xff] }
  0xf0   : > { %1516 = vst [vmem:[#allocation1] ss:$4 sm:$0xff] %v2593_v43 }
  0xf1   : > { %2545 = vmatmul.msk.bf16.gmra.mxu0 %vm367_vm2, %v2535_v50  ;;  %2549 = vmatmul.msk.bf16.gmra.mxu1 %vm367_vm2, %v2535_v50 }
  0xf2   : > { %2553 = vmatmul.msk.bf16.gmra.mxu2 %vm367_vm2, %v2535_v50  ;;  %2557 = vmatmul.msk.bf16.gmra.mxu3 %vm367_vm2, %v2535_v50 }
  0xf5   : > { %v626_v60 = vpop.f32.mrf.mxu2  ;;  %v655_v0 = vpop.f32.mrf.mxu3 }
  0xf6   : > { %v3207_v1 = vadd.f32 %v626_v60, %v3075_v12  ;;  %v3210_v52 = vadd.f32 %v655_v0, %v3077_v13  ;;  %v570_v53 = vpop.f32.mrf.mxu0  ;;  %v599_v56 = vpop.f32.mrf.mxu1 }
  0xf7   : > { %v3213_v58 = vadd.f32 %v570_v53, %v3081_v21  ;;  %v3216_v7 = vadd.f32 %v599_v56, %v3083_v22 }
  0xfd   : > { %v628_v42 = vpop.f32.mrf.mxu2  ;;  %v657_v50 = vpop.f32.mrf.mxu3 }
  0xfe   : > { %v3221_v28 = vadd.f32 %v628_v42, %v3095_v51  ;;  %v3224_v12 = vadd.f32 %v657_v50, %v3097_v54  ;;  %v573_v13 = vpop.f32.mrf.mxu0  ;;  %v602_v60 = vpop.f32.mrf.mxu1  ;;  %v2542_v42 = vld [vmem:[%s3158_s15 + $0x30] sm:$0xf]  ;;  %v2669_v50 = vld [vmem:[%s3158_s15 + $0x34] sm:$0xf0] }
  0xff   : > { %v3227_v0 = vadd.f32 %v573_v13, %v3101_v4  ;;  %v3230_v21 = vadd.f32 %v602_v60, %v3103_v5  ;;  %v2543_v13 = vor.u32 %v2669_v50, %v2542_v42  ;;  %v1517_v50 = vld.sshfl [vmem:[#allocation1] sm:$0xff pattern:$0x73625140] }
 0x101   : > { %2546 = vmatmul.msk.bf16.gmra.mxu0 %vm367_vm2, %v2539_v27  ;;  %2550 = vmatmul.msk.bf16.gmra.mxu1 %vm367_vm2, %v2539_v27 }
 0x102   : > { %2554 = vmatmul.msk.bf16.gmra.mxu2 %vm367_vm2, %v2539_v27  ;;  %2558 = vmatmul.msk.bf16.gmra.mxu3 %vm367_vm2, %v2539_v27 }
 0x105   : > { %v631_v22 = vpop.f32.mrf.mxu2  ;;  %v660_v51 = vpop.f32.mrf.mxu3 }
 0x106   : > { %v3237_v54 = vadd.f32 %v631_v22, %v3109_v19  ;;  %v3240_v4 = vadd.f32 %v660_v51, %v3111_v23  ;;  %v575_v53 = vpop.f32.mrf.mxu0  ;;  %v604_v5 = vpop.f32.mrf.mxu1 }
 0x107   : > { %v3243_v56 = vadd.f32 %v575_v53, %v3113_v29  ;;  %v3246_v14 = vadd.f32 %v604_v5, %v3115_v40  ;;  %v1519_v53 = vld.sshfl [vmem:[#allocation1 + $0x10] sm:$0xff pattern:$0x73625140]  ;;  %v1520_v5 = vld.sshfl [vmem:[#allocation1 + $0x18] sm:$0xff pattern:$0x73625140] }
 0x108   : > { %v1537_v43 = vand.u32 %v1519_v53, %v2875_v3  ;;  %v1539_v42 = vand.u32 %v1520_v5, %v2875_v3 }
 0x10a   : > { %1606 = vmatpush.bf16.msrb.mxu2 %v1537_v43  ;;  %1635 = vmatpush.bf16.msrb.mxu3 %v1539_v42 }
 0x10d   : > { %v633_v19 = vpop.f32.mrf.mxu2  ;;  %v662_v27 = vpop.f32.mrf.mxu3 }
 0x10e   : > { %v3254_v23 = vadd.f32 %v633_v19, %v3128_v61  ;;  %v3257_v60 = vadd.f32 %v662_v27, %v3130_v6  ;;  %v578_v29 = vpop.f32.mrf.mxu0  ;;  %v607_v22 = vpop.f32.mrf.mxu1  ;;  %v1518_v61 = vld.sshfl [vmem:[#allocation1 + $0x8] sm:$0xff pattern:$0x73625140]  ;;  %v1533_v6 = vand.u32 %v1517_v50, %v2875_v3 }
 0x10f   : > { %v3260_v40 = vadd.f32 %v578_v29, %v3134_v8  ;;  %v3263_v51 = vadd.f32 %v607_v22, %v3136_v9  ;;  %v1535_v8 = vand.u32 %v1518_v61, %v2875_v3 }
 0x110   : > { %1548 = vmatpush.bf16.msrb.mxu0 %v1533_v6 }
 0x111   : > { %2547 = vmatmul.msk.bf16.gmra.mxu0 %vm367_vm2, %v2543_v13  ;;  %2551 = vmatmul.msk.bf16.gmra.mxu1 %vm367_vm2, %v2543_v13 }
 0x112   : > { %2555 = vmatmul.msk.bf16.gmra.mxu2 %vm367_vm2, %v2543_v13  ;;  %2559 = vmatmul.msk.bf16.gmra.mxu3 %vm367_vm2, %v2543_v13  ;;  %v2670_v13 = vld [vmem:[%s3289_s26 + $0x4] sm:$0xf0] }
 0x113   : > { %1577 = vmatpush.bf16.msrb.mxu1 %v1535_v8 }
 0x115   : > { %v636_v9 = vpop.f32.mrf.mxu2  ;;  %v665_v19 = vpop.f32.mrf.mxu3 }
 0x116   : > { %v3274_v27 = vadd.f32 %v636_v9, %v3146_v57  ;;  %v3277_v29 = vadd.f32 %v665_v19, %v3148_v10  ;;  %v580_v22 = vpop.f32.mrf.mxu0  ;;  %v609_v53 = vpop.f32.mrf.mxu1  ;;  %v2563_v57 = vld [vmem:[%s3289_s26] sm:$0xf] }
 0x117   : > { %v3280_v5 = vadd.f32 %v580_v22, %v3150_v48  ;;  %v3283_v50 = vadd.f32 %v609_v53, %v3152_v36  ;;  %v2564_v42 = vor.u32 %v2670_v13, %v2563_v57  ;;  %v2567_v13 = vld [vmem:[%s3289_s26 + $0x10] sm:$0xf] }
 0x11d   : > { %v638_v43 = vpop.f32.mrf.mxu2  ;;  %v667_v10 = vpop.f32.mrf.mxu3 }
 0x11e   : > { %v3294_v61 = vadd.f32 %v638_v43, %v3162_v18  ;;  %v3297_v48 = vadd.f32 %v667_v10, %v3164_v49  ;;  %v834_v36 = vpop.f32.mrf.mxu0  ;;  %v863_v6 = vpop.f32.mrf.mxu1  ;;  %v2671_v43 = vld [vmem:[%s3289_s26 + $0x14] sm:$0xf0] }
 0x11f   : > { %v3300_v8 = vadd.f32 %v834_v36, %v3167_v35  ;;  %v3303_v9 = vadd.f32 %v863_v6, %v3170_v31  ;;  %v2568_v36 = vor.u32 %v2671_v43, %v2567_v13  ;;  %v2571_v43 = vld [vmem:[%s3289_s26 + $0x20] sm:$0xf] }
 0x121   : > { %2577 = vmatmul.msk.bf16.vlgmr.msra.gmra.mxu0 %vm367_vm2, %v2564_v42  ;;  %2581 = vmatmul.msk.bf16.vlgmr.msra.gmra.mxu1 %vm367_vm2, %v2564_v42 }
 0x122   : > { %2585 = vmatmul.msk.bf16.vlgmr.msra.gmra.mxu2 %vm367_vm2, %v2564_v42  ;;  %2589 = vmatmul.msk.bf16.vlgmr.msra.gmra.mxu3 %vm367_vm2, %v2564_v42 }
 0x125   : > { %v892_v18 = vpop.f32.mrf.mxu2  ;;  %v921_v49 = vpop.f32.mrf.mxu3 }
 0x126   : > { %v3310_v19 = vadd.f32 %v892_v18, %v3177_v11  ;;  %v3313_v22 = vadd.f32 %v921_v49, %v3180_v24  ;;  %v836_v35 = vpop.f32.mrf.mxu0  ;;  %v865_v53 = vpop.f32.mrf.mxu1 }
 0x127   : > { %v3316_v31 = vadd.f32 %v836_v35, %v3183_v15  ;;  %v3319_v57 = vadd.f32 %v865_v53, %v3186_v44 }
 0x12d   : > { %v894_v10 = vpop.f32.mrf.mxu2  ;;  %v923_v42 = vpop.f32.mrf.mxu3 }
 0x12e   : > { %v3324_v6 = vadd.f32 %v894_v10, %v3191_v45  ;;  %v3327_v11 = vadd.f32 %v923_v42, %v3194_v25  ;;  %v839_v24 = vpop.f32.mrf.mxu0  ;;  %v868_v18 = vpop.f32.mrf.mxu1  ;;  %v2672_v10 = vld [vmem:[%s3289_s26 + $0x24] sm:$0xf0] }
 0x12f   : > { %v3330_v15 = vadd.f32 %v839_v24, %v3197_v38  ;;  %v3333_v44 = vadd.f32 %v868_v18, %v3200_v39  ;;  %v2572_v24 = vor.u32 %v2672_v10, %v2571_v43 }
 0x131   : > { %2578 = vmatmul.msk.bf16.gmra.mxu0 %vm367_vm2, %v2568_v36  ;;  %2582 = vmatmul.msk.bf16.gmra.mxu1 %vm367_vm2, %v2568_v36 }
 0x132   : > { %2586 = vmatmul.msk.bf16.gmra.mxu2 %vm367_vm2, %v2568_v36  ;;  %2590 = vmatmul.msk.bf16.gmra.mxu3 %vm367_vm2, %v2568_v36 }
 0x135   : > { %v897_v45 = vpop.f32.mrf.mxu2  ;;  %v926_v25 = vpop.f32.mrf.mxu3 }
 0x136   : > { %v3340_v49 = vadd.f32 %v897_v45, %v3207_v1  ;;  %v3343_v35 = vadd.f32 %v926_v25, %v3210_v52  ;;  %v841_v38 = vpop.f32.mrf.mxu0  ;;  %v870_v53 = vpop.f32.mrf.mxu1 }
 0x137   : > { %v3346_v39 = vadd.f32 %v841_v38, %v3213_v58  ;;  %v3349_v13 = vadd.f32 %v870_v53, %v3216_v7 }
 0x13d   : > { %v899_v42 = vpop.f32.mrf.mxu2  ;;  %v928_v36 = vpop.f32.mrf.mxu3 }
 0x13e   : > { %v3354_v1 = vadd.f32 %v899_v42, %v3221_v28  ;;  %v3357_v52 = vadd.f32 %v928_v36, %v3224_v12  ;;  %v844_v18 = vpop.f32.mrf.mxu0  ;;  %v873_v45 = vpop.f32.mrf.mxu1  ;;  %v973_v28 = vld [vmem:[%s3158_s15] sm:$0xf]  ;;  %v975_v12 = vld [vmem:[%s3158_s15 + $0x8] sm:$0xf] }
 0x13f   : > { %v3360_v58 = vadd.f32 %v844_v18, %v3227_v0  ;;  %v3363_v7 = vadd.f32 %v873_v45, %v3230_v21  ;;  %v1390_v53 = vshrl.u32 %v973_v28, 16  ;;  %v1393_v0 = vshll.u32 %v973_v28, 16  ;;  %v2610_v28 = vld [vmem:[%s4177_s4 + $0x30] sm:$0xff] }
 0x140   : > { %v1404_v36 = vshrl.u32 %v975_v12, 16  ;;  %1698 = vst [vmem:[#allocation1] ss:$4 sm:$0xff] %v2610_v28 }
 0x141   : > { %2579 = vmatmul.msk.bf16.gmra.mxu0 %vm367_vm2, %v2572_v24  ;;  %2583 = vmatmul.msk.bf16.gmra.mxu1 %vm367_vm2, %v2572_v24 }
 0x142   : > { %2587 = vmatmul.msk.bf16.gmra.mxu2 %vm367_vm2, %v2572_v24  ;;  %2591 = vmatmul.msk.bf16.gmra.mxu3 %vm367_vm2, %v2572_v24  ;;  %v1407_v24 = vshll.u32 %v975_v12, 16  ;;  %v1406_v32 = vrot.slane %v1404_v36, 4 }
 0x144   : > { %v1409_v41 = vrot.slane %v1407_v24, 5 }
 0x145   : > { %v902_v25 = vpop.f32.mrf.mxu2  ;;  %v931_v38 = vpop.f32.mrf.mxu3 }
 0x146   : > { %v3372_v21 = vadd.f32 %v902_v25, %v3237_v54  ;;  %v3375_v43 = vadd.f32 %v931_v38, %v3240_v4  ;;  %v846_v10 = vpop.f32.mrf.mxu0  ;;  %v875_v42 = vpop.f32.mrf.mxu1  ;;  %v2575_v54 = vld [vmem:[%s3289_s26 + $0x30] sm:$0xf]  ;;  %v1392_v25 = vrot.slane %v1390_v53, 4  ;;  %v1395_v4 = vrot.slane %v1393_v0, 5  ;;  %v2673_v38 = vld [vmem:[%s3289_s26 + $0x34] sm:$0xf0]  ;;  %s2366_s26 = scalar_lea.hbm %s4179_s6, %s2674_s18 }
 0x147   : > { %v3378_v18 = vadd.f32 %v846_v10, %v3243_v56  ;;  %v3381_v45 = vadd.f32 %v875_v42, %v3246_v14  ;;  %v2576_v56 = vor.u32 %v2673_v38, %v2575_v54  ;;  %v1410_v0 = vor.u32 %v1409_v41, %v1406_v32  ;;  %v1701_v54 = vld.sshfl [vmem:[#allocation1 + $0x10] sm:$0xff pattern:$0x73625140]  ;;  %v1702_v37 = vld.sshfl [vmem:[#allocation1 + $0x18] sm:$0xff pattern:$0x73625140] }
 0x148   : > { %v1396_v10 = vor.u32 %v1395_v4, %v1392_v25  ;;  %v1721_v25 = vand.u32 %v1702_v37, %v2875_v3  ;;  %v977_v32 = vld [vmem:[%s3158_s15 + $0x10] sm:$0xf]  ;;  %v1401_v4 = vrot.slane %v1399_v46, 5  ;;  %s2369_s12 = sshll.u32 %s2366_s26, 4  ;;  %s2370_s12 = int_to_ptr.hbm [resolvable:$true] %s2369_s12 }
 0x149   : > { %v1411_v38 = vrot.slane %v1410_v0, 4  ;;  %s2732_s9 = sshra.s32 %s2370_s12, 4  ;;  %s2733_s9 = int_to_ptr.hbm [resolvable:$true] %s2732_s9 }
 0x14a   : > { %1817 = vmatpush.bf16.msra.mxu3 %v1721_v25  ;;  %s2734_s10 = scalar_lea.hbm %s2733_s9, 128  ;;  %p2739_p0 = scmp.lt.s32.totalorder %s2733_s9, %s4179_s6 }
 0x14b   : > { %p2735_p11 = scmp.ne.s32.totalorder %s2733_s9, %s2734_s10 }
 0x14d   : > { %v904_v12 = vpop.f32.mrf.mxu2  ;;  %v933_v47 = vpop.f32.mrf.mxu3  ;;  %p2736_p12 = pnand %p2735_p11, %p2858_p5 }
 0x14e   : > { %v3391_v14 = vadd.f32 %v904_v12, %v3254_v23  ;;  %v3394_v42 = vadd.f32 %v933_v47, %v3257_v60  ;;  %v849_v28 = vpop.f32.mrf.mxu0  ;;  %v878_v53 = vpop.f32.mrf.mxu1  ;;  %v1719_v23 = vand.u32 %v1701_v54, %v2875_v3  ;;  %v1699_v47 = vld.sshfl [vmem:[#allocation1] sm:$0xff pattern:$0x73625140]  ;;  %v1700_v60 = vld.sshfl [vmem:[#allocation1 + $0x8] sm:$0xff pattern:$0x73625140] }
 0x14f   : > { %v3397_v36 = vadd.f32 %v849_v28, %v3260_v40  ;;  %v3400_v24 = vadd.f32 %v878_v53, %v3263_v51  ;;  %v1715_v2 = vand.u32 %v1699_v47, %v2875_v3  ;;  %v1717_v41 = vand.u32 %v1700_v60, %v2875_v3  ;;  %v979_v40 = vld [vmem:[%s3158_s15 + $0x18] sm:$0xf]  ;;  %p2737_p13 = pneg %p2736_p12 }
 0x150   : > { %v1397_v51 = vrot.slane %v1396_v10, 4  ;;  %v1415_v12 = vrot.slane %v1413_v34, 5  ;;  %1788 = vmatpush.bf16.msra.mxu2 %v1719_v23  ;;  %v1418_v28 = vshrl.u32 %v977_v32, 16  ;;  %v1421_v53 = vshll.u32 %v977_v32, 16 }
 0x151   : > { %2580 = vmatmul.msk.bf16.gmra.mxu0 %vm367_vm2, %v2576_v56  ;;  %2584 = vmatmul.msk.bf16.gmra.mxu1 %vm367_vm2, %v2576_v56  ;;  %v1432_v54 = vshrl.u32 %v979_v40, 16  ;;  %v1435_v37 = vshll.u32 %v979_v40, 16 }
 0x152   : > { %2588 = vmatmul.msk.bf16.gmra.mxu2 %vm367_vm2, %v2576_v56  ;;  %2592 = vmatmul.msk.bf16.gmra.mxu3 %vm367_vm2, %v2576_v56  ;;  %v1402_v10 = vsel %vm3006_vm5, %v1397_v51, %v1401_v4  ;;  %v1416_v0 = vsel %vm3006_vm5, %v1411_v38, %v1415_v12 }
 0x153   : > { %1730 = vmatpush.bf16.msra.mxu0 %v1715_v2  ;;  %1759 = vmatpush.bf16.msra.mxu1 %v1717_v41  ;;  %v1420_v2 = vrot.slane %v1418_v28, 4  ;;  %v1434_v41 = vrot.slane %v1432_v54, 4  ;;  %v1437_v32 = vrot.slane %v1435_v37, 5  ;;  %v1504_v40 = vunpack.c.l.b16 %v1416_v0 }
 0x155   : > { %v907_v47 = vpop.f32.mrf.mxu2  ;;  %v936_v60 = vpop.f32.mrf.mxu3  ;;  %v1438_v51 = vor.u32 %v1437_v32, %v1434_v41 }
 0x156   : > { %v3413_v33 = vadd.f32 %v907_v47, %v3274_v27  ;;  %v3416_v56 = vadd.f32 %v936_v60, %v3277_v29  ;;  %v851_v46 = vpop.f32.mrf.mxu0  ;;  %v880_v34 = vpop.f32.mrf.mxu1  ;;  %v1423_v27 = vrot.slane %v1421_v53, 5  ;;  %v1503_v29 = vunpack.c.l.b16 %v1402_v10  ;;  %v978_v47 = vld [vmem:[%s3158_s15 + $0x14] sm:$0x1]  ;;  %v980_v60 = vld [vmem:[%s3158_s15 + $0x1c] sm:$0x1] }
 0x157   : > { %v3423_v23 = vadd.f32 %v851_v46, %v3280_v5  ;;  %v3426_v25 = vadd.f32 %v880_v34, %v3283_v50  ;;  %v1427_v20 = vshll.u32 %v978_v47, 16  ;;  %v1441_v4 = vshll.u32 %v980_v60, 16 }
 0x158   : > { %v1424_v30 = vor.u32 %v1423_v27, %v1420_v2  ;;  %v1511_v5 = vpack.c.b16 %v1504_v40, %v1503_v29  ;;  %v1439_v10 = vrot.slane %v1438_v51, 4 }
 0x159   : > { %v1429_v34 = vrot.slane %v1427_v20, 5  ;;  %v1443_v0 = vrot.slane %v1441_v4, 5 }
 0x15a   : > { %v1425_v46 = vrot.slane %v1424_v30, 4 }
 0x15d   : > { %v909_v17 = vpop.f32.mrf.mxu2  ;;  %v938_v38 = vpop.f32.mrf.mxu3 }
 0x15e   : > { %v3431_v50 = vadd.f32 %v909_v17, %v3294_v61  ;;  %v3434_v12 = vadd.f32 %v938_v38, %v3297_v48  ;;  %v1046_v28 = vpop.f32.mrf.mxu0  ;;  %v1075_v53 = vpop.f32.mrf.mxu1  ;;  %v981_v17 = vld [vmem:[%s3158_s15 + $0x20] sm:$0xf]  ;;  %v983_v61 = vld [vmem:[%s3158_s15 + $0x28] sm:$0xf]  ;;  %v1430_v48 = vsel %vm3006_vm5, %v1425_v46, %v1429_v34  ;;  %v982_v34 = vld [vmem:[%s3158_s15 + $0x24] sm:$0x1] }
 0x15f   : > { %v3437_v54 = vadd.f32 %v1046_v28, %v3300_v8  ;;  %v3440_v37 = vadd.f32 %v1075_v53, %v3303_v9  ;;  %v1444_v8 = vsel %vm3006_vm5, %v1439_v10, %v1443_v0  ;;  %v1446_v9 = vshrl.u32 %v981_v17, 16 }
 0x160   : > { %v1449_v2 = vshll.u32 %v981_v17, 16  ;;  %v1460_v27 = vshrl.u32 %v983_v61, 16  ;;  %v1463_v41 = vshll.u32 %v983_v61, 16  ;;  %v1505_v4 = vunpack.c.l.b16 %v1430_v48 }
 0x161   : > { %2594 = vmatmul.msk.bf16.vlgmr.msrb.gmra.mxu0 %vm367_vm2, %v1511_v5  ;;  %2598 = vmatmul.msk.bf16.vlgmr.msrb.gmra.mxu1 %vm367_vm2, %v1511_v5  ;;  %v1506_v38 = vunpack.c.l.b16 %v1444_v8  ;;  %v1455_v61 = vshll.u32 %v982_v34, 16 }
 0x162   : > { %2602 = vmatmul.msk.bf16.vlgmr.msrb.gmra.mxu2 %vm367_vm2, %v1511_v5  ;;  %2606 = vmatmul.msk.bf16.vlgmr.msrb.gmra.mxu3 %vm367_vm2, %v1511_v5  ;;  %v1448_v5 = vrot.slane %v1446_v9, 4  ;;  %v1451_v28 = vrot.slane %v1449_v2, 5  ;;  %v1462_v53 = vrot.slane %v1460_v27, 4  ;;  %v1465_v46 = vrot.slane %v1463_v41, 5 }
 0x163   : > { %v1512_v10 = vpack.c.b16 %v1506_v38, %v1505_v4  ;;  %v1457_v41 = vrot.slane %v1455_v61, 5 }
 0x164   : > { %v1452_v17 = vor.u32 %v1451_v28, %v1448_v5 }
 0x165   : > { %v1104_v30 = vpop.f32.mrf.mxu2  ;;  %v1133_v20 = vpop.f32.mrf.mxu3 }
 0x166   : > { %v3453_v32 = vadd.f32 %v1104_v30, %v3310_v19  ;;  %v3456_v29 = vadd.f32 %v1133_v20, %v3313_v22  ;;  %v1048_v40 = vpop.f32.mrf.mxu0  ;;  %v1077_v47 = vpop.f32.mrf.mxu1  ;;  %v984_v19 = vld [vmem:[%s3158_s15 + $0x2c] sm:$0x1]  ;;  %v1466_v30 = vor.u32 %v1465_v46, %v1462_v53  ;;  %v1453_v27 = vrot.slane %v1452_v17, 4 }
 0x167   : > { %v3459_v60 = vadd.f32 %v1048_v40, %v3316_v31  ;;  %v3462_v51 = vadd.f32 %v1077_v47, %v3319_v57  ;;  %v1469_v31 = vshll.u32 %v984_v19, 16  ;;  %v987_v47 = vld [vmem:[%s3158_s15 + $0x38] sm:$0xf] }
 0x168   : > { %v1467_v40 = vrot.slane %v1466_v30, 4 }
 0x16d   : > { %v1106_v0 = vpop.f32.mrf.mxu2  ;;  %v1135_v22 = vpop.f32.mrf.mxu3 }
 0x16e   : > { %v3467_v57 = vadd.f32 %v1106_v0, %v3324_v6  ;;  %v3470_v48 = vadd.f32 %v1135_v22, %v3327_v11  ;;  %v1051_v8 = vpop.f32.mrf.mxu0  ;;  %v1080_v20 = vpop.f32.mrf.mxu1  ;;  %v1471_v6 = vrot.slane %v1469_v31, 5  ;;  %v985_v11 = vld [vmem:[%s3158_s15 + $0x30] sm:$0xf]  ;;  %v1491_v0 = vshll.u32 %v987_v47, 16 }
 0x16f   : > { %v3473_v9 = vadd.f32 %v1051_v8, %v3330_v15  ;;  %v3476_v2 = vadd.f32 %v1080_v20, %v3333_v44  ;;  %v1458_v44 = vsel %vm3006_vm5, %v1453_v27, %v1457_v41  ;;  %v1474_v5 = vshrl.u32 %v985_v11, 16  ;;  %v986_v20 = vld [vmem:[%s3158_s15 + $0x34] sm:$0x1]  ;;  %v988_v41 = vld [vmem:[%s3158_s15 + $0x3c] sm:$0x1]  ;;  %s2472_s15 = sshll.u32 %s287_s14, 7 }
 0x170   : > { %v1472_v38 = vsel %vm3006_vm5, %v1467_v40, %v1471_v6  ;;  %v1477_v28 = vshll.u32 %v985_v11, 16  ;;  %v1507_v61 = vunpack.c.l.b16 %v1458_v44  ;;  %v1493_v27 = vrot.slane %v1491_v0, 5  ;;  %s4039_s16 = scalar_lea.vmem [#allocation2], %s2472_s15 }
 0x171   : > { %2595 = vmatmul.msk.bf16.gmra.mxu0 %vm367_vm2, %v1512_v10  ;;  %2599 = vmatmul.msk.bf16.gmra.mxu1 %vm367_vm2, %v1512_v10  ;;  %v1508_v30 = vunpack.c.l.b16 %v1472_v38  ;;  %v1476_v31 = vrot.slane %v1474_v5, 4  ;;  %v1497_v38 = vshll.u32 %v988_v41, 16  ;;  %s2367_s25 = sshll.u32 %s4039_s16, 4  ;;  %s2368_s25 = int_to_ptr.vmem [resolvable:$true] %s2367_s25 }
 0x172   : > { %2603 = vmatmul.msk.bf16.gmra.mxu2 %vm367_vm2, %v1512_v10  ;;  %2607 = vmatmul.msk.bf16.gmra.mxu3 %vm367_vm2, %v1512_v10  ;;  %v1488_v10 = vshrl.u32 %v987_v47, 16  ;;  %v1479_v8 = vrot.slane %v1477_v28, 5 }
 0x173   : > { %v1513_v6 = vpack.c.b16 %v1508_v30, %v1507_v61 }
 0x174   : > { %v1480_v11 = vor.u32 %v1479_v8, %v1476_v31 }
 0x175   : > { %v1109_v4 = vpop.f32.mrf.mxu2  ;;  %v1138_v15 = vpop.f32.mrf.mxu3 }
 0x176   : > { %v3489_v53 = vadd.f32 %v1109_v4, %v3340_v49  ;;  %v3492_v46 = vadd.f32 %v1138_v15, %v3343_v35  ;;  %v1053_v34 = vpop.f32.mrf.mxu0  ;;  %v1082_v19 = vpop.f32.mrf.mxu1  ;;  %v1490_v49 = vrot.slane %v1488_v10, 4  ;;  %v1483_v4 = vshll.u32 %v986_v20, 16 }
 0x177   : > { %v3495_v22 = vadd.f32 %v1053_v34, %v3346_v39  ;;  %v3498_v17 = vadd.f32 %v1082_v19, %v3349_v13  ;;  %v1499_v19 = vrot.slane %v1497_v38, 5 }
 0x178   : > { %v1494_v44 = vor.u32 %v1493_v27, %v1490_v49 }
 0x17a   : > { %v1495_v34 = vrot.slane %v1494_v44, 4 }
 0x17c   : > { %v1500_v8 = vsel %vm3006_vm5, %v1495_v34, %v1499_v19 }
 0x17d   : > { %v1111_v35 = vpop.f32.mrf.mxu2  ;;  %v1140_v40 = vpop.f32.mrf.mxu3  ;;  %v1510_v27 = vunpack.c.l.b16 %v1500_v8 }
 0x17e   : > { %v3503_v47 = vadd.f32 %v1111_v35, %v3354_v1  ;;  %v3506_v39 = vadd.f32 %v1140_v40, %v3357_v52  ;;  %v1056_v13 = vpop.f32.mrf.mxu0  ;;  %v1085_v15 = vpop.f32.mrf.mxu1  ;;  %v1481_v1 = vrot.slane %v1480_v11, 4  ;;  %v1485_v52 = vrot.slane %v1483_v4, 5 }
 0x17f   : > { %v3509_v5 = vadd.f32 %v1056_v13, %v3360_v58  ;;  %v3512_v28 = vadd.f32 %v1085_v15, %v3363_v7 }
 0x180   : > { %v1486_v31 = vsel %vm3006_vm5, %v1481_v1, %v1485_v52 }
 0x181   : > { %2596 = vmatmul.msk.bf16.gmra.mxu0 %vm367_vm2, %v1513_v6  ;;  %2600 = vmatmul.msk.bf16.gmra.mxu1 %vm367_vm2, %v1513_v6 }
 0x182   : > { %2604 = vmatmul.msk.bf16.gmra.mxu2 %vm367_vm2, %v1513_v6  ;;  %2608 = vmatmul.msk.bf16.gmra.mxu3 %vm367_vm2, %v1513_v6 }
 0x185   : > { %v1114_v10 = vpop.f32.mrf.mxu2  ;;  %v1143_v0 = vpop.f32.mrf.mxu3 }
 0x186   : > { %v3519_v58 = vadd.f32 %v1114_v10, %v3372_v21  ;;  %v3522_v7 = vadd.f32 %v1143_v0, %v3375_v43  ;;  %v1058_v61 = vpop.f32.mrf.mxu0  ;;  %v1087_v30 = vpop.f32.mrf.mxu1  ;;  %v2627_v21 = vld [vmem:[%s4177_s4 + $0x38] sm:$0xff]  ;;  %v1509_v43 = vunpack.c.l.b16 %v1486_v31 }
 0x187   : > { %v3529_v20 = vadd.f32 %v1058_v61, %v3378_v18  ;;  %v3532_v49 = vadd.f32 %v1087_v30, %v3381_v45  ;;  %1880 = vst [vmem:[#allocation1] ss:$4 sm:$0xff] %v2627_v21 }
 0x188   : > { %v1514_v40 = vpack.c.b16 %v1510_v27, %v1509_v43 }
 0x18d   : > { %v1116_v41 = vpop.f32.mrf.mxu2  ;;  %v1145_v35 = vpop.f32.mrf.mxu3 }
 0x18e   : > { %v3538_v6 = vadd.f32 %v1116_v41, %v3391_v14  ;;  %v3541_v11 = vadd.f32 %v1145_v35, %v3394_v42  ;;  %v1061_v18 = vpop.f32.mrf.mxu0  ;;  %v1090_v4 = vpop.f32.mrf.mxu1  ;;  %v1883_v15 = vld.sshfl [vmem:[#allocation1 + $0x10] sm:$0xff pattern:$0x73625140]  ;;  %v1884_v44 = vld.sshfl [vmem:[#allocation1 + $0x18] sm:$0xff pattern:$0x73625140] }
 0x18f   : > { %v3544_v45 = vadd.f32 %v1061_v18, %v3397_v36  ;;  %v3547_v13 = vadd.f32 %v1090_v4, %v3400_v24  ;;  %v1901_v38 = vand.u32 %v1883_v15, %v2875_v3  ;;  %v1903_v1 = vand.u32 %v1884_v44, %v2875_v3  ;;  %v1881_v52 = vld.sshfl [vmem:[#allocation1] sm:$0xff pattern:$0x73625140]  ;;  %v1882_v14 = vld.sshfl [vmem:[#allocation1 + $0x8] sm:$0xff pattern:$0x73625140] }
 0x190   : > { %v1897_v42 = vand.u32 %v1881_v52, %v2875_v3  ;;  %v1899_v36 = vand.u32 %v1882_v14, %v2875_v3  ;;  %v4221_v44 = vunpack.c.l.b16 %v2978_v62 }
 0x191   : > { %2597 = vmatmul.msk.bf16.gmra.mxu0 %vm367_vm2, %v1514_v40  ;;  %2601 = vmatmul.msk.bf16.gmra.mxu1 %vm367_vm2, %v1514_v40 }
 0x192   : > { %2605 = vmatmul.msk.bf16.gmra.mxu2 %vm367_vm2, %v1514_v40  ;;  %2609 = vmatmul.msk.bf16.gmra.mxu3 %vm367_vm2, %v1514_v40 }
 0x193   : > { %1970 = vmatpush.bf16.msrb.mxu2 %v1901_v38  ;;  %1999 = vmatpush.bf16.msrb.mxu3 %v1903_v1 }
 0x194   : > { %1912 = vmatpush.bf16.msrb.mxu0 %v1897_v42  ;;  %1941 = vmatpush.bf16.msrb.mxu1 %v1899_v36 }
 0x195   : > { %v1119_v24 = vpop.f32.mrf.mxu2  ;;  %v1148_v34 = vpop.f32.mrf.mxu3 }
 0x196   : > { %v3558_v19 = vadd.f32 %v1119_v24, %v3413_v33  ;;  %v3561_v10 = vadd.f32 %v1148_v34, %v3416_v56  ;;  %v1063_v0 = vpop.f32.mrf.mxu0  ;;  %v1092_v61 = vpop.f32.mrf.mxu1  ;;  %v4222_v34 = vunpack.c.l.b16 %v2981_v63 }
 0x197   : > { %v3564_v30 = vadd.f32 %v1063_v0, %v3423_v23  ;;  %v3567_v31 = vadd.f32 %v1092_v61, %v3426_v25  ;;  %v4223_v0 = vunpack.c.l.b16 %v2995_v16 }
 0x199   : > { %v1695_v61 = vpack.c.b16 %v4223_v0, %v4222_v34 }
 0x19d   : > { %v1121_v8 = vpop.f32.mrf.mxu2  ;;  %v1150_v21 = vpop.f32.mrf.mxu3 }
 0x19e   : > { %v3570_v43 = vadd.f32 %v1121_v8, %v3431_v50  ;;  %v3573_v27 = vadd.f32 %v1150_v21, %v3434_v12  ;;  %v1250_v33 = vpop.f32.mrf.mxu0  ;;  %v1279_v41 = vpop.f32.mrf.mxu1 }
 0x19f   : > { %v3576_v56 = vadd.f32 %v1250_v33, %v3437_v54  ;;  %v3579_v35 = vadd.f32 %v1279_v41, %v3440_v37 }
 0x1a1   : > { %2611 = vmatmul.msk.bf16.vlgmr.msra.gmra.mxu0 %vm367_vm2, %v2960_v55  ;;  %2615 = vmatmul.msk.bf16.vlgmr.msra.gmra.mxu1 %vm367_vm2, %v2960_v55 }
 0x1a2   : > { %2619 = vmatmul.msk.bf16.vlgmr.msra.gmra.mxu2 %vm367_vm2, %v2960_v55  ;;  %2623 = vmatmul.msk.bf16.vlgmr.msra.gmra.mxu3 %vm367_vm2, %v2960_v55  ;;  %v4220_v55 = vunpack.c.l.b16 %v2968_v59 }
 0x1a4   : > { %v1694_v38 = vpack.c.b16 %v4221_v44, %v4220_v55 }
 0x1a5   : > { %v1308_v23 = vpop.f32.mrf.mxu2  ;;  %v1337_v25 = vpop.f32.mrf.mxu3 }
 0x1a6   : > { %v3590_v50 = vadd.f32 %v1308_v23, %v3453_v32  ;;  %v3593_v12 = vadd.f32 %v1337_v25, %v3456_v29  ;;  %v1252_v54 = vpop.f32.mrf.mxu0  ;;  %v1281_v37 = vpop.f32.mrf.mxu1  ;;  %v2644_v25 = vld [vmem:[%s4177_s4 + $0x40] sm:$0xff] }
 0x1a7   : > { %v3596_v40 = vadd.f32 %v1252_v54, %v3459_v60  ;;  %v3599_v18 = vadd.f32 %v1281_v37, %v3462_v51  ;;  %2075 = vst [vmem:[#allocation1] ss:$4 sm:$0xff] %v2644_v25  ;;  %v4224_v37 = vld [vmem:[#allocation11_spill] sm:$0xff] }
 0x1ad   : > { %v1310_v4 = vpop.f32.mrf.mxu2  ;;  %v1339_v15 = vpop.f32.mrf.mxu3 }
 0x1ae   : > { %v3606_v32 = vadd.f32 %v1310_v4, %v3467_v57  ;;  %v3609_v29 = vadd.f32 %v1339_v15, %v3470_v48  ;;  %v1255_v1 = vpop.f32.mrf.mxu0  ;;  %v1284_v52 = vpop.f32.mrf.mxu1  ;;  %v4225_v4 = vunpack.c.l.b16 %v4224_v37 }
 0x1af   : > { %v3612_v60 = vadd.f32 %v1255_v1, %v3473_v9  ;;  %v3615_v51 = vadd.f32 %v1284_v52, %v3476_v2  ;;  %v2078_v52 = vld.sshfl [vmem:[#allocation1 + $0x10] sm:$0xff pattern:$0x73625140] }
 0x1b1   : > { %2612 = vmatmul.msk.bf16.gmra.mxu0 %vm367_vm2, %v1694_v38  ;;  %2616 = vmatmul.msk.bf16.gmra.mxu1 %vm367_vm2, %v1694_v38 }
 0x1b2   : > { %2620 = vmatmul.msk.bf16.gmra.mxu2 %vm367_vm2, %v1694_v38  ;;  %2624 = vmatmul.msk.bf16.gmra.mxu3 %vm367_vm2, %v1694_v38 }
 0x1b5   : > { %v1313_v59 = vpop.f32.mrf.mxu2  ;;  %v1342_v62 = vpop.f32.mrf.mxu3 }
 0x1b6   : > { %v3622_v57 = vadd.f32 %v1313_v59, %v3489_v53  ;;  %v3625_v48 = vadd.f32 %v1342_v62, %v3492_v46  ;;  %v1257_v9 = vpop.f32.mrf.mxu0  ;;  %v1286_v14 = vpop.f32.mrf.mxu1  ;;  %v2079_v59 = vld.sshfl [vmem:[#allocation1 + $0x18] sm:$0xff pattern:$0x73625140]  ;;  %v2096_v62 = vand.u32 %v2078_v52, %v2875_v3 }
 0x1b7   : > { %v3628_v2 = vadd.f32 %v1257_v9, %v3495_v22  ;;  %v3631_v42 = vadd.f32 %v1286_v14, %v3498_v17  ;;  %v2098_v9 = vand.u32 %v2079_v59, %v2875_v3  ;;  %v2076_v14 = vld.sshfl [vmem:[#allocation1] sm:$0xff pattern:$0x73625140] }
 0x1b8   : > { %2165 = vmatpush.bf16.msra.mxu2 %v2096_v62 }
 0x1b9   : > { %2194 = vmatpush.bf16.msra.mxu3 %v2098_v9 }
 0x1bd   : > { %v1315_v36 = vpop.f32.mrf.mxu2  ;;  %v1344_v24 = vpop.f32.mrf.mxu3 }
 0x1be   : > { %v3638_v53 = vadd.f32 %v1315_v36, %v3503_v47  ;;  %v3641_v46 = vadd.f32 %v1344_v24, %v3506_v39  ;;  %v1260_v8 = vpop.f32.mrf.mxu0  ;;  %v1289_v22 = vpop.f32.mrf.mxu1 }
 0x1bf   : > { %v3644_v21 = vadd.f32 %v1260_v8, %v3509_v5  ;;  %v3647_v17 = vadd.f32 %v1289_v22, %v3512_v28  ;;  %v3660_v28 = vld [vmem:[%s2948_s28 + $0x40] sm:$0xf] }
 0x1c1   : > { %2613 = vmatmul.msk.bf16.gmra.mxu0 %vm367_vm2, %v1695_v61  ;;  %2617 = vmatmul.msk.bf16.gmra.mxu1 %vm367_vm2, %v1695_v61 }
 0x1c2   : > { %2621 = vmatmul.msk.bf16.gmra.mxu2 %vm367_vm2, %v1695_v61  ;;  %2625 = vmatmul.msk.bf16.gmra.mxu3 %vm367_vm2, %v1695_v61 }
 0x1c5   : > { %v1318_v63 = vpop.f32.mrf.mxu2  ;;  %v1347_v16 = vpop.f32.mrf.mxu3 }
 0x1c6   : > { %v3654_v47 = vadd.f32 %v1318_v63, %v3519_v58  ;;  %v3657_v39 = vadd.f32 %v1347_v16, %v3522_v7  ;;  %v1262_v5 = vpop.f32.mrf.mxu0  ;;  %v1291_v33 = vpop.f32.mrf.mxu1  ;;  %v1692_v58 = vunpack.c.l.b16 %v3660_v28 }
 0x1c7   : > { %v3663_v41 = vadd.f32 %v1262_v5, %v3529_v20  ;;  %v3666_v23 = vadd.f32 %v1291_v33, %v3532_v49 }
 0x1c8   : > { %v1696_v15 = vpack.c.b16 %v1692_v58, %v4225_v4 }
 0x1cd   : > { %v1320_v54 = vpop.f32.mrf.mxu2  ;;  %v1349_v7 = vpop.f32.mrf.mxu3 }
 0x1ce   : > { %v3675_v55 = vadd.f32 %v1320_v54, %v3538_v6  ;;  %v3678_v20 = vadd.f32 %v1349_v7, %v3541_v11  ;;  %v1265_v49 = vpop.f32.mrf.mxu0  ;;  %v1294_v44 = vpop.f32.mrf.mxu1  ;;  %v2077_v6 = vld.sshfl [vmem:[#allocation1 + $0x8] sm:$0xff pattern:$0x73625140]  ;;  %v2092_v11 = vand.u32 %v2076_v14, %v2875_v3 }
 0x1cf   : > { %v3681_v38 = vadd.f32 %v1265_v49, %v3544_v45  ;;  %v3684_v1 = vadd.f32 %v1294_v44, %v3547_v13  ;;  %v2094_v45 = vand.u32 %v2077_v6, %v2875_v3  ;;  %v4229_v44 = vld [vmem:[#allocation7_spill] sm:$0xff] }
 0x1d0   : > { %2107 = vmatpush.bf16.msra.mxu0 %v2092_v11  ;;  %v4230_v52 = vunpack.c.l.b16 %v4229_v44  ;;  %v4235_v44 = vld [vmem:[#allocation10_spill] sm:$0xff] }
 0x1d1   : > { %2614 = vmatmul.msk.bf16.gmra.mxu0 %vm367_vm2, %v1696_v15  ;;  %2618 = vmatmul.msk.bf16.gmra.mxu1 %vm367_vm2, %v1696_v15 }
 0x1d2   : > { %2622 = vmatmul.msk.bf16.gmra.mxu2 %vm367_vm2, %v1696_v15  ;;  %2626 = vmatmul.msk.bf16.gmra.mxu3 %vm367_vm2, %v1696_v15  ;;  %v4227_v15 = vld [vmem:[#allocation6_spill] sm:$0xff] }
 0x1d3   : > { %2136 = vmatpush.bf16.msra.mxu1 %v2094_v45  ;;  %v4228_v49 = vunpack.c.l.b16 %v4227_v15 }
 0x1d5   : > { %v1323_v13 = vpop.f32.mrf.mxu2  ;;  %v1352_v36 = vpop.f32.mrf.mxu3  ;;  %v1876_v59 = vpack.c.b16 %v4230_v52, %v4228_v49  ;;  %v4236_v52 = vunpack.c.l.b16 %v4235_v44  ;;  %v2057_v44 = vshll.u32 %v3660_v28, 16 }
 0x1d6   : > { %v3695_v24 = vadd.f32 %v1323_v13, %v3558_v19  ;;  %v3698_v34 = vadd.f32 %v1352_v36, %v3561_v10  ;;  %v1267_v0 = vpop.f32.mrf.mxu0  ;;  %v1296_v61 = vpop.f32.mrf.mxu1 }
 0x1d7   : > { %v3701_v3 = vadd.f32 %v1267_v0, %v3564_v30  ;;  %v3704_v8 = vadd.f32 %v1296_v61, %v3567_v31  ;;  %v4226_v30 = vld [vmem:[#allocation5_spill] sm:$0xff]  ;;  %v4231_v0 = vld [vmem:[#allocation8_spill] sm:$0xff] }
 0x1d8   : > { %v4232_v61 = vunpack.c.l.b16 %v4231_v0 }
 0x1dd   : > { %v1325_v22 = vpop.f32.mrf.mxu2  ;;  %v1354_v63 = vpop.f32.mrf.mxu3 }
 0x1de   : > { %v3707_v16 = vadd.f32 %v1325_v22, %v3570_v43  ;;  %v3710_v5 = vadd.f32 %v1354_v63, %v3573_v27  ;;  %v1550_v19 = vpop.f32.mrf.mxu0  ;;  %v1579_v33 = vpop.f32.mrf.mxu1  ;;  %v4233_v22 = vld [vmem:[#allocation9_spill] sm:$0xff] }
 0x1df   : > { %v3713_v10 = vadd.f32 %v1550_v19, %v3576_v56  ;;  %v3716_v25 = vadd.f32 %v1579_v33, %v3579_v35  ;;  %v4234_v63 = vunpack.c.l.b16 %v4233_v22 }
 0x1e1   : > { %2628 = vmatmul.msk.bf16.vlgmr.msrb.gmra.mxu0 %vm367_vm2, %v4226_v30  ;;  %2632 = vmatmul.msk.bf16.vlgmr.msrb.gmra.mxu1 %vm367_vm2, %v4226_v30  ;;  %v1877_v19 = vpack.c.b16 %v4234_v63, %v4232_v61 }
 0x1e2   : > { %2636 = vmatmul.msk.bf16.vlgmr.msrb.gmra.mxu2 %vm367_vm2, %v4226_v30  ;;  %2640 = vmatmul.msk.bf16.vlgmr.msrb.gmra.mxu3 %vm367_vm2, %v4226_v30 }
 0x1e5   : > { %v1608_v31 = vpop.f32.mrf.mxu2  ;;  %v1637_v43 = vpop.f32.mrf.mxu3 }
 0x1e6   : > { %v3727_v27 = vadd.f32 %v1608_v31, %v3590_v50  ;;  %v3730_v56 = vadd.f32 %v1637_v43, %v3593_v12  ;;  %v1552_v35 = vpop.f32.mrf.mxu0  ;;  %v1581_v58 = vpop.f32.mrf.mxu1 }
 0x1e7   : > { %v3733_v54 = vadd.f32 %v1552_v35, %v3596_v40  ;;  %v3736_v7 = vadd.f32 %v1581_v58, %v3599_v18 }
 0x1ed   : > { %v1610_v37 = vpop.f32.mrf.mxu2  ;;  %v1639_v4 = vpop.f32.mrf.mxu3 }
 0x1ee   : > { %v3743_v50 = vadd.f32 %v1610_v37, %v3606_v32  ;;  %v3746_v12 = vadd.f32 %v1639_v4, %v3609_v29  ;;  %v1555_v62 = vpop.f32.mrf.mxu0  ;;  %v1584_v9 = vpop.f32.mrf.mxu1 }
 0x1ef   : > { %v3749_v40 = vadd.f32 %v1555_v62, %v3612_v60  ;;  %v3752_v18 = vadd.f32 %v1584_v9, %v3615_v51 }
 0x1f1   : > { %2629 = vmatmul.msk.bf16.gmra.mxu0 %vm367_vm2, %v1876_v59  ;;  %2633 = vmatmul.msk.bf16.gmra.mxu1 %vm367_vm2, %v1876_v59 }
 0x1f2   : > { %2637 = vmatmul.msk.bf16.gmra.mxu2 %vm367_vm2, %v1876_v59  ;;  %2641 = vmatmul.msk.bf16.gmra.mxu3 %vm367_vm2, %v1876_v59 }
 0x1f5   : > { %v1613_v32 = vpop.f32.mrf.mxu2  ;;  %v1642_v14 = vpop.f32.mrf.mxu3 }
 0x1f6   : > { %v3759_v29 = vadd.f32 %v1613_v32, %v3622_v57  ;;  %v3762_v6 = vadd.f32 %v1642_v14, %v3625_v48  ;;  %v1557_v60 = vpop.f32.mrf.mxu0  ;;  %v1586_v11 = vpop.f32.mrf.mxu1 }
 0x1f7   : > { %v3765_v51 = vadd.f32 %v1557_v60, %v3628_v2  ;;  %v3768_v45 = vadd.f32 %v1586_v11, %v3631_v42 }
 0x1fd   : > { %v1615_v13 = vpop.f32.mrf.mxu2  ;;  %v1644_v36 = vpop.f32.mrf.mxu3 }
 0x1fe   : > { %v3775_v57 = vadd.f32 %v1615_v13, %v3638_v53  ;;  %v3778_v48 = vadd.f32 %v1644_v36, %v3641_v46  ;;  %v1560_v33 = vpop.f32.mrf.mxu0  ;;  %v1589_v2 = vpop.f32.mrf.mxu1 }
 0x1ff   : > { %v3781_v30 = vadd.f32 %v1560_v33, %v3644_v21  ;;  %v3784_v42 = vadd.f32 %v1589_v2, %v3647_v17  ;;  %v338_v17 = vld [vmem:[%s2884_s17 + $0x40] sm:$0xf]  ;;  %s2738_s17 = scalar_lea.hbm %s4179_s6, 256 }
 0x200   : > { %v1874_v4 = vunpack.c.l.b16 %v338_v17  ;;  %p2740_p1 = scmp.lt.s32.totalorder %s2738_s17, %s2734_s10 }
 0x201   : > { %2630 = vmatmul.msk.bf16.gmra.mxu0 %vm367_vm2, %v1877_v19  ;;  %2634 = vmatmul.msk.bf16.gmra.mxu1 %vm367_vm2, %v1877_v19 }
 0x202   : > { %2638 = vmatmul.msk.bf16.gmra.mxu2 %vm367_vm2, %v1877_v19  ;;  %2642 = vmatmul.msk.bf16.gmra.mxu3 %vm367_vm2, %v1877_v19  ;;  %v1878_v59 = vpack.c.b16 %v1874_v4, %v4236_v52  ;;  %p2741_p2 = por %p2740_p1, %p2739_p0 }
 0x204   : > { %p2742_p3 = pnand %p2741_p2, %p2737_p13 }
 0x205   : > { %v1618_v53 = vpop.f32.mrf.mxu2  ;;  %v1647_v31 = vpop.f32.mrf.mxu3 }
 0x206   : > { %v3791_v46 = vadd.f32 %v1618_v53, %v3654_v47  ;;  %v3794_v43 = vadd.f32 %v1647_v31, %v3657_v39  ;;  %v1562_v21 = vpop.f32.mrf.mxu0  ;;  %v1591_v35 = vpop.f32.mrf.mxu1 }
 0x207   : > { %v3798_v58 = vadd.f32 %v1562_v21, %v3663_v41  ;;  %v3801_v37 = vadd.f32 %v1591_v35, %v3666_v23  ;;  %v4238_v21 = vld [vmem:[#allocation13_spill] sm:$0xff]  ;;  %v4239_v35 = vld [vmem:[#allocation14_spill] sm:$0xff] }
 0x208   : > { %v2071_v17 = vpack.c.b16 %v4239_v35, %v4238_v21 }
 0x20d   : > { %v1620_v15 = vpop.f32.mrf.mxu2  ;;  %v1649_v49 = vpop.f32.mrf.mxu3 }
 0x20e   : > { %v3806_v47 = vadd.f32 %v1620_v15, %v3675_v55  ;;  %v3809_v39 = vadd.f32 %v1649_v49, %v3678_v20  ;;  %v1565_v62 = vpop.f32.mrf.mxu0  ;;  %v1594_v9 = vpop.f32.mrf.mxu1 }
 0x20f   : > { %v3812_v41 = vadd.f32 %v1565_v62, %v3681_v38  ;;  %v3815_v23 = vadd.f32 %v1594_v9, %v3684_v1 }
 0x211   : > { %2631 = vmatmul.msk.bf16.gmra.mxu0 %vm367_vm2, %v1878_v59  ;;  %2635 = vmatmul.msk.bf16.gmra.mxu1 %vm367_vm2, %v1878_v59 }
 0x212   : > { %2639 = vmatmul.msk.bf16.gmra.mxu2 %vm367_vm2, %v1878_v59  ;;  %2643 = vmatmul.msk.bf16.gmra.mxu3 %vm367_vm2, %v1878_v59 }
 0x215   : > { %v1623_v55 = vpop.f32.mrf.mxu2  ;;  %v1652_v32 = vpop.f32.mrf.mxu3 }
 0x216   : > { %v3822_v20 = vadd.f32 %v1623_v55, %v3695_v24  ;;  %v3825_v14 = vadd.f32 %v1652_v32, %v3698_v34  ;;  %v1567_v38 = vpop.f32.mrf.mxu0  ;;  %v1596_v60 = vpop.f32.mrf.mxu1  ;;  %v2059_v32 = vrot.slane %v2057_v44, 5 }
 0x217   : > { %v3828_v1 = vadd.f32 %v1567_v38, %v3701_v3  ;;  %v3831_v11 = vadd.f32 %v1596_v60, %v3704_v8  ;;  %v4237_v3 = vld [vmem:[#allocation12_spill] sm:$0xff] }
 0x218   : > { %v328_v38 = vld [vmem:[%s2948_s28 + $0x44] sm:$0x1] }
 0x21d   : > { %v1625_v13 = vpop.f32.mrf.mxu2  ;;  %v1654_v36 = vpop.f32.mrf.mxu3 }
 0x21e   : > { %v3834_v0 = vadd.f32 %v1625_v13, %v3707_v16  ;;  %v3837_v61 = vadd.f32 %v1654_v36, %v3710_v5  ;;  %v1732_v24 = vpop.f32.mrf.mxu0  ;;  %v1761_v22 = vpop.f32.mrf.mxu1  ;;  %v4241_v36 = vld [vmem:[#allocation16_spill] sm:$0xff] }
 0x21f   : > { %v3840_v34 = vadd.f32 %v1732_v24, %v3713_v10  ;;  %v3843_v63 = vadd.f32 %v1761_v22, %v3716_v25 }
 0x221   : > { %2645 = vmatmul.msk.bf16.vlgmr.msra.gmra.mxu0 %vm367_vm2, %v4237_v3  ;;  %2649 = vmatmul.msk.bf16.vlgmr.msra.gmra.mxu1 %vm367_vm2, %v4237_v3 }
 0x222   : > { %2653 = vmatmul.msk.bf16.vlgmr.msra.gmra.mxu2 %vm367_vm2, %v4237_v3  ;;  %2657 = vmatmul.msk.bf16.vlgmr.msra.gmra.mxu3 %vm367_vm2, %v4237_v3 }
 0x225   : > { %v1790_v8 = vpop.f32.mrf.mxu2  ;;  %v1819_v16 = vpop.f32.mrf.mxu3 }
 0x226   : > { %v3854_v5 = vadd.f32 %v1790_v8, %v3727_v27  ;;  %v3857_v10 = vadd.f32 %v1819_v16, %v3730_v56  ;;  %v1734_v25 = vpop.f32.mrf.mxu0  ;;  %v1763_v19 = vpop.f32.mrf.mxu1  ;;  %v2063_v8 = vshll.u32 %v328_v38, 16 }
 0x227   : > { %v3860_v33 = vadd.f32 %v1734_v25, %v3733_v54  ;;  %v3863_v2 = vadd.f32 %v1763_v19, %v3736_v7 }
 0x22d   : > { %v1792_v53 = vpop.f32.mrf.mxu2  ;;  %v1821_v31 = vpop.f32.mrf.mxu3 }
 0x22e   : > { %v3868_v4 = vadd.f32 %v1792_v53, %v3743_v50  ;;  %v3871_v27 = vadd.f32 %v1821_v31, %v3746_v12  ;;  %v1737_v56 = vpop.f32.mrf.mxu0  ;;  %v1766_v15 = vpop.f32.mrf.mxu1  ;;  %v2054_v12 = vshrl.u32 %v3660_v28, 16  ;;  %v4240_v28 = vld [vmem:[#allocation15_spill] sm:$0xff] }
 0x22f   : > { %v3874_v49 = vadd.f32 %v1737_v56, %v3749_v40  ;;  %v3877_v54 = vadd.f32 %v1766_v15, %v3752_v18 }
 0x230   : > { %v2056_v55 = vrot.slane %v2054_v12, 4 }
 0x231   : > { %2646 = vmatmul.msk.bf16.gmra.mxu0 %vm367_vm2, %v2071_v17  ;;  %2650 = vmatmul.msk.bf16.gmra.mxu1 %vm367_vm2, %v2071_v17 }
 0x232   : > { %2654 = vmatmul.msk.bf16.gmra.mxu2 %vm367_vm2, %v2071_v17  ;;  %2658 = vmatmul.msk.bf16.gmra.mxu3 %vm367_vm2, %v2071_v17  ;;  %v2060_v3 = vor.u32 %v2059_v32, %v2056_v55 }
 0x235   : > { %v1795_v7 = vpop.f32.mrf.mxu2  ;;  %v1824_v50 = vpop.f32.mrf.mxu3 }
 0x236   : > { %v3886_v40 = vadd.f32 %v1795_v7, %v3759_v29  ;;  %v3889_v18 = vadd.f32 %v1824_v50, %v3762_v6  ;;  %v1739_v52 = vpop.f32.mrf.mxu0  ;;  %v1768_v59 = vpop.f32.mrf.mxu1  ;;  %v2072_v29 = vpack.c.b16 %v4241_v36, %v4240_v28  ;;  %v4242_v50 = vld [vmem:[#allocation17_spill] sm:$0xff] }
 0x237   : > { %v3892_v62 = vadd.f32 %v1739_v52, %v3765_v51  ;;  %v3895_v9 = vadd.f32 %v1768_v59, %v3768_v45 }
 0x23d   : > { %v1797_v60 = vpop.f32.mrf.mxu2  ;;  %v1826_v13 = vpop.f32.mrf.mxu3 }
 0x23e   : > { %v3901_v24 = vadd.f32 %v1797_v60, %v3775_v57  ;;  %v3904_v6 = vadd.f32 %v1826_v13, %v3778_v48  ;;  %v1742_v22 = vpop.f32.mrf.mxu0  ;;  %v1771_v51 = vpop.f32.mrf.mxu1  ;;  %v2061_v57 = vrot.slane %v2060_v3, 4  ;;  %v2065_v48 = vrot.slane %v2063_v8, 5 }
 0x23f   : > { %v3907_v45 = vadd.f32 %v1742_v22, %v3781_v30  ;;  %v3910_v16 = vadd.f32 %v1771_v51, %v3784_v42 }
 0x240   : > { %v2066_v21 = vsel %vm3006_vm5, %v2061_v57, %v2065_v48 }
 0x241   : > { %2647 = vmatmul.msk.bf16.gmra.mxu0 %vm367_vm2, %v2072_v29  ;;  %2651 = vmatmul.msk.bf16.gmra.mxu1 %vm367_vm2, %v2072_v29  ;;  %v2069_v56 = vunpack.c.l.b16 %v2066_v21 }
 0x242   : > { %2655 = vmatmul.msk.bf16.gmra.mxu2 %vm367_vm2, %v2072_v29  ;;  %2659 = vmatmul.msk.bf16.gmra.mxu3 %vm367_vm2, %v2072_v29 }
 0x245   : > { %v1800_v25 = vpop.f32.mrf.mxu2  ;;  %v1829_v19 = vpop.f32.mrf.mxu3 }
 0x246   : > { %v3917_v53 = vadd.f32 %v1800_v25, %v3791_v46  ;;  %v3920_v30 = vadd.f32 %v1829_v19, %v3794_v43  ;;  %v1744_v42 = vpop.f32.mrf.mxu0  ;;  %v1773_v31 = vpop.f32.mrf.mxu1  ;;  %v2073_v46 = vpack.c.b16 %v2069_v56, %v4242_v50 }
 0x247   : > { %v3925_v35 = vadd.f32 %v1744_v42, %v3798_v58  ;;  %v3928_v17 = vadd.f32 %v1773_v31, %v3801_v37 }
 0x24d   : > { %v1802_v15 = vpop.f32.mrf.mxu2  ;;  %v1831_v7 = vpop.f32.mrf.mxu3 }
 0x24e   : > { %v3932_v12 = vadd.f32 %v1802_v15, %v3806_v47  ;;  %v3935_v43 = vadd.f32 %v1831_v7, %v3809_v39  ;;  %v1747_v44 = vpop.f32.mrf.mxu0  ;;  %v1776_v26 = vpop.f32.mrf.mxu1 }
 0x24f   : > { %v3938_v52 = vadd.f32 %v1747_v44, %v3812_v41  ;;  %v3941_v58 = vadd.f32 %v1776_v26, %v3815_v23 }
 0x251   : > { %4243 = vst [vmem:[#allocation11_spill] sm:$0xff] %v3941_v58  ;;  %2648 = vmatmul.msk.bf16.gmra.mxu0 %vm367_vm2, %v2073_v46  ;;  %2652 = vmatmul.msk.bf16.gmra.mxu1 %vm367_vm2, %v2073_v46 }
 0x252   : > { %2656 = vmatmul.msk.bf16.gmra.mxu2 %vm367_vm2, %v2073_v46  ;;  %2660 = vmatmul.msk.bf16.gmra.mxu3 %vm367_vm2, %v2073_v46 }
 0x255   : > { %v1805_v37 = vpop.f32.mrf.mxu2  ;;  %v1834_v47 = vpop.f32.mrf.mxu3 }
 0x256   : > { %v3948_v39 = vadd.f32 %v1805_v37, %v3822_v20  ;;  %v3951_v59 = vadd.f32 %v1834_v47, %v3825_v14  ;;  %v1749_v41 = vpop.f32.mrf.mxu0  ;;  %v1778_v55 = vpop.f32.mrf.mxu1 }
 0x257   : > { %v3954_v23 = vadd.f32 %v1749_v41, %v3828_v1  ;;  %v3957_v32 = vadd.f32 %v1778_v55, %v3831_v11 }
 0x258   : > { %4244 = vst [vmem:[#allocation5_spill] sm:$0xff] %v3948_v39 }
 0x259   : > { %4245 = vst [vmem:[#allocation6_spill] sm:$0xff] %v3951_v59 }
 0x25a   : > { %4246 = vst [vmem:[#allocation7_spill] sm:$0xff] %v3954_v23 }
 0x25b   : > { %4247 = vst [vmem:[#allocation8_spill] sm:$0xff] %v3957_v32 }
 0x25d   : > { %v1807_v38 = vpop.f32.mrf.mxu2  ;;  %v1836_v60 = vpop.f32.mrf.mxu3 }
 0x25e   : > { %v3960_v13 = vadd.f32 %v1807_v38, %v3834_v0  ;;  %v3963_v28 = vadd.f32 %v1836_v60, %v3837_v61  ;;  %v1914_v20 = vpop.f32.mrf.mxu0  ;;  %v1943_v36 = vpop.f32.mrf.mxu1  ;;  %v2248_v38 = vld [vmem:[%s4178_s5] sm:$0xf] }
 0x25f   : > { %v2021_v60 = vadd.f32 %v1914_v20, %v3840_v34  ;;  %v4022_v23 = vperm.slane %v2248_v38, 0 }
 0x260   : > { %4248 = vst [vmem:[#allocation9_spill] sm:$0xff] %v3960_v13 }
 0x261   : > { %4249 = vst [vmem:[#allocation10_spill] sm:$0xff] %v3963_v28  ;;  %v2022_v28 = vadd.f32 %v1943_v36, %v3843_v63 }
 0x265   : > { %v1972_v14 = vpop.f32.mrf.mxu2  ;;  %v2001_v29 = vpop.f32.mrf.mxu3 }
 0x266   : > { %v1916_v22 = vpop.f32.mrf.mxu0  ;;  %v1945_v51 = vpop.f32.mrf.mxu1  ;;  %v2023_v36 = vadd.f32 %v1972_v14, %v3854_v5 }
 0x267   : > { %v2025_v58 = vadd.f32 %v1916_v22, %v3860_v33 }
 0x26d   : > { %v3965_v3 = vpop.f32.mrf.mxu2  ;;  %v3967_v1 = vpop.f32.mrf.mxu3 }
 0x26e   : > { %v3969_v11 = vpop.f32.mrf.mxu0  ;;  %v3971_v8 = vpop.f32.mrf.mxu1 }
 0x275   : > { %v3973_v57 = vpop.f32.mrf.mxu2  ;;  %v3975_v0 = vpop.f32.mrf.mxu3 }
 0x276   : > { %v3977_v61 = vpop.f32.mrf.mxu0  ;;  %v3979_v48 = vpop.f32.mrf.mxu1 }
 0x27d   : > { %v3981_v25 = vpop.f32.mrf.mxu2  ;;  %v3983_v19 = vpop.f32.mrf.mxu3 }
 0x27e   : > { %v3985_v42 = vpop.f32.mrf.mxu0  ;;  %v3987_v31 = vpop.f32.mrf.mxu1 }
 0x285   : > { %v3989_v21 = vpop.f32.mrf.mxu2  ;;  %v3991_v56 = vpop.f32.mrf.mxu3 }
 0x286   : > { %v3993_v15 = vpop.f32.mrf.mxu0  ;;  %v3995_v7 = vpop.f32.mrf.mxu1 }
 0x28d   : > { %v3997_v50 = vpop.f32.mrf.mxu2  ;;  %v3999_v46 = vpop.f32.mrf.mxu3 }
 0x28e   : > { %v4001_v44 = vpop.f32.mrf.mxu0  ;;  %v4003_v26 = vpop.f32.mrf.mxu1 }
 0x28f   : > { %4250 = vst [vmem:[#allocation12_spill] sm:$0xff] %v4001_v44 }
 0x290   : > { %4251 = vst [vmem:[#allocation13_spill] sm:$0xff] %v4003_v26  ;;  %v4035_v26 = vperm.slane %v2248_v38, 3 }
 0x295   : > { %v4005_v37 = vpop.f32.mrf.mxu2  ;;  %v4007_v47 = vpop.f32.mrf.mxu3 }
 0x296   : > { %4252 = vst [vmem:[#allocation14_spill] sm:$0xff] %v4005_v37  ;;  %v4009_v41 = vpop.f32.mrf.mxu0  ;;  %v4011_v55 = vpop.f32.mrf.mxu1 }
 0x297   : > { %4253 = vst [vmem:[#allocation15_spill] sm:$0xff] %v4007_v47  ;;  %v4024_v47 = vperm.slane %v2248_v38, 1 }
 0x298   : > { %4254 = vst [vmem:[#allocation16_spill] sm:$0xff] %v4009_v41 }
 0x299   : > { %4255 = vst [vmem:[#allocation17_spill] sm:$0xff] %v4011_v55 }
 0x29d   : > { %v4018_v13 = vpop.f32.mrf.mxu2  ;;  %v4020_v32 = vpop.f32.mrf.mxu3 }
 0x29e   : > { %4256 = vst [vmem:[#allocation18_spill] sm:$0xff] %v4018_v13  ;;  %v2109_v59 = vpop.f32.mrf.mxu0  ;;  %v2138_v41 = vpop.f32.mrf.mxu1  ;;  %v4033_v13 = vperm.slane %v2248_v38, 2 }
 0x29f   : > { %4257 = vst [vmem:[#allocation19_spill] sm:$0xff] %v4020_v32  ;;  %v2216_v55 = vadd.f32 %v2109_v59, %v2021_v60  ;;  %v2217_v37 = vadd.f32 %v2138_v41, %v2022_v28  ;;  %v2024_v32 = vadd.f32 %v2001_v29, %v3857_v10  ;;  %v2026_v59 = vadd.f32 %v1945_v51, %v3863_v2 }
 0x2a1   : > { %v2258_v39 = vadd.f32 %v4022_v23, %v2216_v55  ;;  %v2259_v34 = vadd.f32 %v4024_v47, %v2217_v37 }
 0x2a3   : > { %v2290_v63 = vmax.f32 %v2258_v39, 0.0  ;;  %v2291_v20 = vmax.f32 %v2259_v34, 0.0  ;;  %v2027_v34 = vadd.f32 %v3965_v3, %v3868_v4 }
 0x2a5   : > { %v2322_v28 = vpack.c.bf16 %v2291_v20, %v2290_v63  ;;  %v2167_v41 = vpop.f32.mrf.mxu2  ;;  %v2196_v55 = vpop.f32.mrf.mxu3  ;;  %v2029_v20 = vadd.f32 %v3969_v11, %v3874_v49 }
 0x2a6   : > { %v2218_v60 = vadd.f32 %v2167_v41, %v2023_v36  ;;  %v2219_v44 = vadd.f32 %v2196_v55, %v2024_v32  ;;  %v2111_v37 = vpop.f32.mrf.mxu0  ;;  %v2140_v39 = vpop.f32.mrf.mxu1 }
 0x2a7   : > { %2338 = vst [vmem:[%s4039_s16] sm:$0xff] %v2322_v28  ;;  %v2220_v5 = vadd.f32 %v2111_v37, %v2025_v58  ;;  %v2221_v10 = vadd.f32 %v2140_v39, %v2026_v59  ;;  %v2028_v58 = vadd.f32 %v3967_v1, %v3871_v27 }
 0x2a8   : > { %v2260_v14 = vadd.f32 %v4033_v13, %v2218_v60  ;;  %v2261_v33 = vadd.f32 %v4035_v26, %v2219_v44  ;;  %v2030_v44 = vadd.f32 %v3971_v8, %v3877_v54 }
 0x2a9   : > { %v2262_v2 = vadd.f32 %v4022_v23, %v2220_v5  ;;  %v2263_v29 = vadd.f32 %v4024_v47, %v2221_v10  ;;  %v2031_v10 = vadd.f32 %v3973_v57, %v3886_v40 }
 0x2aa   : > { %v2292_v22 = vmax.f32 %v2260_v14, 0.0  ;;  %v2293_v51 = vmax.f32 %v2261_v33, 0.0  ;;  %v2032_v14 = vadd.f32 %v3975_v0, %v3889_v18 }
 0x2ab   : > { %v2294_v32 = vmax.f32 %v2262_v2, 0.0  ;;  %v2295_v38 = vmax.f32 %v2263_v29, 0.0  ;;  %v2033_v2 = vadd.f32 %v3977_v61, %v3892_v62  ;;  %v2034_v29 = vadd.f32 %v3979_v48, %v3895_v9 }
 0x2ac   : > { %v2323_v63 = vpack.c.bf16 %v2293_v51, %v2292_v22 }
 0x2ad   : > { %v2324_v36 = vpack.c.bf16 %v2295_v38, %v2294_v32  ;;  %v2169_v59 = vpop.f32.mrf.mxu2  ;;  %v2198_v28 = vpop.f32.mrf.mxu3 }
 0x2ae   : > { %2339 = vst [vmem:[%s4039_s16 + $0x8] sm:$0xff] %v2323_v63  ;;  %v2222_v41 = vadd.f32 %v2169_v59, %v2027_v34  ;;  %v2223_v55 = vadd.f32 %v2198_v28, %v2028_v58  ;;  %v2114_v60 = vpop.f32.mrf.mxu0  ;;  %v2143_v37 = vpop.f32.mrf.mxu1  ;;  %v2036_v59 = vadd.f32 %v3983_v19, %v3904_v6 }
 0x2af   : > { %2340 = vst [vmem:[%s4039_s16 + $0x10] sm:$0xff] %v2324_v36  ;;  %v2224_v4 = vadd.f32 %v2114_v60, %v2029_v20  ;;  %v2225_v3 = vadd.f32 %v2143_v37, %v2030_v44  ;;  %v2035_v36 = vadd.f32 %v3981_v25, %v3901_v24 }
 0x2b0   : > { %v2264_v27 = vadd.f32 %v4033_v13, %v2222_v41  ;;  %v2265_v1 = vadd.f32 %v4035_v26, %v2223_v55  ;;  %v2037_v41 = vadd.f32 %v3985_v42, %v3907_v45  ;;  %v2038_v55 = vadd.f32 %v3987_v31, %v3910_v16 }
 0x2b1   : > { %v2266_v49 = vadd.f32 %v4022_v23, %v2224_v4  ;;  %v2267_v54 = vadd.f32 %v4024_v47, %v2225_v3 }
 0x2b2   : > { %v2296_v11 = vmax.f32 %v2264_v27, 0.0  ;;  %v2297_v8 = vmax.f32 %v2265_v1, 0.0 }
 0x2b3   : > { %v2298_v39 = vmax.f32 %v2266_v49, 0.0  ;;  %v2299_v5 = vmax.f32 %v2267_v54, 0.0 }
 0x2b4   : > { %v2325_v33 = vpack.c.bf16 %v2297_v8, %v2296_v11  ;;  %v2039_v8 = vadd.f32 %v3989_v21, %v3917_v53 }
 0x2b5   : > { %v2326_v22 = vpack.c.bf16 %v2299_v5, %v2298_v39  ;;  %v2172_v51 = vpop.f32.mrf.mxu2  ;;  %v2201_v32 = vpop.f32.mrf.mxu3  ;;  %v2040_v39 = vadd.f32 %v3991_v56, %v3920_v30 }
 0x2b6   : > { %2341 = vst [vmem:[%s4039_s16 + $0x18] sm:$0xff] %v2325_v33  ;;  %v2226_v38 = vadd.f32 %v2172_v51, %v2031_v10  ;;  %v2227_v34 = vadd.f32 %v2201_v32, %v2032_v14  ;;  %v2116_v58 = vpop.f32.mrf.mxu0  ;;  %v2145_v63 = vpop.f32.mrf.mxu1  ;;  %v2041_v10 = vadd.f32 %v3993_v15, %v3925_v35  ;;  %v2042_v14 = vadd.f32 %v3995_v7, %v3928_v17 }
 0x2b7   : > { %2342 = vst [vmem:[%s4039_s16 + $0x20] sm:$0xff] %v2326_v22  ;;  %v2228_v40 = vadd.f32 %v2116_v58, %v2033_v2  ;;  %v2229_v57 = vadd.f32 %v2145_v63, %v2034_v29  ;;  %v2043_v63 = vadd.f32 %v3997_v50, %v3932_v12 }
 0x2b8   : > { %v2268_v18 = vadd.f32 %v4033_v13, %v2226_v38  ;;  %v2269_v0 = vadd.f32 %v4035_v26, %v2227_v34 }
 0x2b9   : > { %v2270_v62 = vadd.f32 %v4022_v23, %v2228_v40  ;;  %v2271_v9 = vadd.f32 %v4024_v47, %v2229_v57  ;;  %v2044_v40 = vadd.f32 %v3999_v46, %v3935_v43 }
 0x2ba   : > { %v2300_v61 = vmax.f32 %v2268_v18, 0.0  ;;  %v2301_v48 = vmax.f32 %v2269_v0, 0.0  ;;  %v4258_v18 = vld [vmem:[#allocation12_spill] sm:$0xff] }
 0x2bb   : > { %v2302_v20 = vmax.f32 %v2270_v62, 0.0  ;;  %v2303_v44 = vmax.f32 %v2271_v9, 0.0  ;;  %v2045_v0 = vadd.f32 %v4258_v18, %v3938_v52  ;;  %v4259_v62 = vld [vmem:[#allocation11_spill] sm:$0xff]  ;;  %v4260_v9 = vld [vmem:[#allocation13_spill] sm:$0xff] }
 0x2bc   : > { %v2327_v28 = vpack.c.bf16 %v2301_v48, %v2300_v61  ;;  %v2046_v61 = vadd.f32 %v4260_v9, %v4259_v62 }
 0x2bd   : > { %v2328_v60 = vpack.c.bf16 %v2303_v44, %v2302_v20  ;;  %v2174_v37 = vpop.f32.mrf.mxu2  ;;  %v2203_v4 = vpop.f32.mrf.mxu3 }
 0x2be   : > { %2343 = vst [vmem:[%s4039_s16 + $0x28] sm:$0xff] %v2327_v28  ;;  %v2230_v3 = vadd.f32 %v2174_v37, %v2035_v36  ;;  %v2231_v27 = vadd.f32 %v2203_v4, %v2036_v59  ;;  %v2119_v1 = vpop.f32.mrf.mxu0  ;;  %v2148_v49 = vpop.f32.mrf.mxu1 }
 0x2bf   : > { %2344 = vst [vmem:[%s4039_s16 + $0x30] sm:$0xff] %v2328_v60  ;;  %v2232_v24 = vadd.f32 %v2119_v1, %v2037_v41  ;;  %v2233_v25 = vadd.f32 %v2148_v49, %v2038_v55  ;;  %v4262_v1 = vld [vmem:[#allocation14_spill] sm:$0xff] }
 0x2c0   : > { %v2272_v6 = vadd.f32 %v4033_v13, %v2230_v3  ;;  %v2273_v19 = vadd.f32 %v4035_v26, %v2231_v27  ;;  %v4261_v27 = vld [vmem:[#allocation5_spill] sm:$0xff] }
 0x2c1   : > { %v2274_v45 = vadd.f32 %v4022_v23, %v2232_v24  ;;  %v2275_v16 = vadd.f32 %v4024_v47, %v2233_v25  ;;  %v2047_v49 = vadd.f32 %v4262_v1, %v4261_v27  ;;  %v4263_v24 = vld [vmem:[#allocation6_spill] sm:$0xff]  ;;  %v4264_v25 = vld [vmem:[#allocation15_spill] sm:$0xff] }
 0x2c2   : > { %v2304_v42 = vmax.f32 %v2272_v6, 0.0  ;;  %v2305_v31 = vmax.f32 %v2273_v19, 0.0  ;;  %v2048_v6 = vadd.f32 %v4264_v25, %v4263_v24 }
 0x2c3   : > { %v2306_v54 = vmax.f32 %v2274_v45, 0.0  ;;  %v2307_v11 = vmax.f32 %v2275_v16, 0.0  ;;  %v4265_v45 = vld [vmem:[#allocation7_spill] sm:$0xff]  ;;  %v4266_v16 = vld [vmem:[#allocation16_spill] sm:$0xff] }
 0x2c4   : > { %v2329_v5 = vpack.c.bf16 %v2305_v31, %v2304_v42  ;;  %v2049_v42 = vadd.f32 %v4266_v16, %v4265_v45  ;;  %v4267_v31 = vld [vmem:[#allocation8_spill] sm:$0xff] }
 0x2c5   : > { %v2330_v33 = vpack.c.bf16 %v2307_v11, %v2306_v54  ;;  %v2177_v2 = vpop.f32.mrf.mxu2  ;;  %v2206_v29 = vpop.f32.mrf.mxu3  ;;  %v4268_v54 = vld [vmem:[#allocation17_spill] sm:$0xff] }
 0x2c6   : > { %2345 = vst [vmem:[%s4039_s16 + $0x38] sm:$0xff] %v2329_v5  ;;  %v2234_v22 = vadd.f32 %v2177_v2, %v2039_v8  ;;  %v2235_v51 = vadd.f32 %v2206_v29, %v2040_v39  ;;  %v2121_v32 = vpop.f32.mrf.mxu0  ;;  %v2150_v38 = vpop.f32.mrf.mxu1  ;;  %v2050_v11 = vadd.f32 %v4268_v54, %v4267_v31 }
 0x2c7   : > { %2346 = vst [vmem:[%s4039_s16 + $0x40] sm:$0xff] %v2330_v33  ;;  %v2236_v53 = vadd.f32 %v2121_v32, %v2041_v10  ;;  %v2237_v21 = vadd.f32 %v2150_v38, %v2042_v14 }
 0x2c8   : > { %v2276_v30 = vadd.f32 %v4033_v13, %v2234_v22  ;;  %v2277_v56 = vadd.f32 %v4035_v26, %v2235_v51 }
 0x2c9   : > { %v2278_v35 = vadd.f32 %v4022_v23, %v2236_v53  ;;  %v2279_v17 = vadd.f32 %v4024_v47, %v2237_v21 }
 0x2ca   : > { %v2308_v15 = vmax.f32 %v2276_v30, 0.0  ;;  %v2309_v7 = vmax.f32 %v2277_v56, 0.0 }
 0x2cb   : > { %v2310_v34 = vmax.f32 %v2278_v35, 0.0  ;;  %v2311_v58 = vmax.f32 %v2279_v17, 0.0  ;;  %v4269_v17 = vld [vmem:[#allocation9_spill] sm:$0xff] }
 0x2cc   : > { %v2331_v57 = vpack.c.bf16 %v2309_v7, %v2308_v15  ;;  %v4270_v15 = vld [vmem:[#allocation18_spill] sm:$0xff] }
 0x2cd   : > { %v2332_v48 = vpack.c.bf16 %v2311_v58, %v2310_v34  ;;  %v2179_v20 = vpop.f32.mrf.mxu2  ;;  %v2208_v44 = vpop.f32.mrf.mxu3  ;;  %v2051_v7 = vadd.f32 %v4270_v15, %v4269_v17  ;;  %v4271_v34 = vld [vmem:[#allocation10_spill] sm:$0xff]  ;;  %v4272_v58 = vld [vmem:[#allocation19_spill] sm:$0xff] }
 0x2ce   : > { %2347 = vst [vmem:[%s4039_s16 + $0x48] sm:$0xff] %v2331_v57  ;;  %v2238_v36 = vadd.f32 %v2179_v20, %v2043_v63  ;;  %v2239_v59 = vadd.f32 %v2208_v44, %v2044_v40  ;;  %v2124_v28 = vpop.f32.mrf.mxu0  ;;  %v2153_v41 = vpop.f32.mrf.mxu1  ;;  %v2052_v63 = vadd.f32 %v4272_v58, %v4271_v34 }
 0x2cf   : > { %2348 = vst [vmem:[%s4039_s16 + $0x50] sm:$0xff] %v2332_v48  ;;  %v2240_v12 = vadd.f32 %v2124_v28, %v2045_v0  ;;  %v2241_v50 = vadd.f32 %v2153_v41, %v2046_v61 }
 0x2d0   : > { %v2280_v43 = vadd.f32 %v4033_v13, %v2238_v36  ;;  %v2281_v46 = vadd.f32 %v4035_v26, %v2239_v59 }
 0x2d1   : > { %v2282_v52 = vadd.f32 %v4022_v23, %v2240_v12  ;;  %v2283_v55 = vadd.f32 %v4024_v47, %v2241_v50 }
 0x2d2   : > { %v2312_v60 = vmax.f32 %v2280_v43, 0.0  ;;  %v2313_v37 = vmax.f32 %v2281_v46, 0.0 }
 0x2d3   : > { %v2314_v4 = vmax.f32 %v2282_v52, 0.0  ;;  %v2315_v3 = vmax.f32 %v2283_v55, 0.0 }
 0x2d4   : > { %v2333_v19 = vpack.c.bf16 %v2313_v37, %v2312_v60 }
 0x2d5   : > { %v2334_v8 = vpack.c.bf16 %v2315_v3, %v2314_v4  ;;  %v2182_v39 = vpop.f32.mrf.mxu2  ;;  %v2211_v5 = vpop.f32.mrf.mxu3 }
 0x2d6   : > { %2349 = vst [vmem:[%s4039_s16 + $0x58] sm:$0xff] %v2333_v19  ;;  %v2242_v10 = vadd.f32 %v2182_v39, %v2047_v49  ;;  %v2243_v14 = vadd.f32 %v2211_v5, %v2048_v6  ;;  %v2126_v33 = vpop.f32.mrf.mxu0  ;;  %v2155_v2 = vpop.f32.mrf.mxu1 }
 0x2d7   : > { %2350 = vst [vmem:[%s4039_s16 + $0x60] sm:$0xff] %v2334_v8  ;;  %v2244_v29 = vadd.f32 %v2126_v33, %v2049_v42  ;;  %v2245_v22 = vadd.f32 %v2155_v2, %v2050_v11 }
 0x2d8   : > { %v2284_v51 = vadd.f32 %v4033_v13, %v2242_v10  ;;  %v2285_v32 = vadd.f32 %v4035_v26, %v2243_v14 }
 0x2d9   : > { %v2286_v38 = vadd.f32 %v4022_v23, %v2244_v29  ;;  %v2287_v53 = vadd.f32 %v4024_v47, %v2245_v22 }
 0x2da   : > { %v2316_v21 = vmax.f32 %v2284_v51, 0.0  ;;  %v2317_v30 = vmax.f32 %v2285_v32, 0.0 }
 0x2db   : > { %v2318_v56 = vmax.f32 %v2286_v38, 0.0  ;;  %v2319_v35 = vmax.f32 %v2287_v53, 0.0 }
 0x2dc   : > { %v2335_v40 = vpack.c.bf16 %v2317_v30, %v2316_v21 }
 0x2dd   : > { %v2336_v57 = vpack.c.bf16 %v2319_v35, %v2318_v56  ;;  %v2184_v18 = vpop.f32.mrf.mxu2  ;;  %v2213_v23 = vpop.f32.mrf.mxu3 }
 0x2de   : > { %2351 = vst [vmem:[%s4039_s16 + $0x68] sm:$0xff] %v2335_v40  ;;  %v2246_v47 = vadd.f32 %v2184_v18, %v2051_v7  ;;  %v2247_v0 = vadd.f32 %v2213_v23, %v2052_v63 }
 0x2df   : > { %2352 = vst [vmem:[%s4039_s16 + $0x70] sm:$0xff] %v2336_v57 }
 0x2e0   : > { %v2288_v62 = vadd.f32 %v4033_v13, %v2246_v47  ;;  %v2289_v9 = vadd.f32 %v4035_v26, %v2247_v0 }
 0x2e2   : > { %v2320_v61 = vmax.f32 %v2288_v62, 0.0  ;;  %v2321_v48 = vmax.f32 %v2289_v9, 0.0 }
 0x2e4   : > { %v2337_v20 = vpack.c.bf16 %v2321_v48, %v2320_v61 }
 0x2e6   : > { %2353 = vst [vmem:[%s4039_s16 + $0x78] sm:$0xff] %v2337_v20 }
 0x2e7   : > { %2745 = shalt.err (!%p2742_p3)
}
 0x2e8   : > { %s2783_s14 = smov 256   ;;  %s2784_s16 = smov 16  }
 0x2e9   : > { %2676 = dma.vmem_to_hbm [thread:$0]  (%p2858_p5), %s2368_s25, 2048, %s2370_s12, %s2355_s29, %s2783_s14, %s2783_s14, %s2784_s16  }
 0x2ea PF: > { %p2682_p4 = scmp.ge.s32.totalorder %s2780_s24, 2  ;;  %s2384_s18 = sand.u32 1, %s2768_s21  }
 0x2eb   : > { %s2385_s19 = scalar_lea.sflag [#allocation3], %s2384_s18 }
 0x2ec   : > { %p2679_p7 = pnand %p2682_p4, %p2862_p6 }
 0x2ee   : > { %p2680_p8 = pneg %p2679_p7 }
 0x2f0   : > { %2763 = dma.done.wait (%p2680_p8), %s2385_s19, 2048  }
 0x2f1   : > { %2765 = vsyncadd (%p2680_p8), %s2385_s19, 4294965248  ;;  %p16_p9 = scmp.ge.s32.totalorder %s2845_s27, 4   ;;  %s4273_s21 = smov %s2772_s22 }
 0x2f2   : > { %s4274_s22 = smov %s2776_s23  ;;  %s4275_s23 = smov %s2856_s30 }
 0x2f3   : > { %s4276_s24 = smov %s2845_s27  ;;  %18 = sbr.rel (!%p16_p9) target bundleno = 3 (0x3), region = 96 }
 0x2f8   :  { %2391 = vsyncpa [#allocation3], 1 }
 0x2f9   :  { %2393 = vsyncpa [#allocation3 + $0x1], 1 }

</bundles_post_ra>
